<compile_context>
chip_gen: v5e
topology: v5e:2x2
jax: 0.10.0
libtpu: 0.0.40
codegen_flags: <defaults>
</compile_context>

<pallas_src>
import functools
import math

import jax
import jax.numpy as jnp
import numpy as np
from jax.experimental import pallas as pl
from jax.experimental.pallas import tpu as pltpu

LEAKY_SLOPE = 0.01
VAR_EPS = 1e-4
LOGVAR_CLAMP = 88.0   # just below float32 exp overflow; only prevents inf


def _pad8(n):
    return ((n + 7) // 8) * 8


def _pad128(n):
    return ((n + 127) // 128) * 128


def _leaky_relu(x):
    return jnp.where(x > 0, x, LEAKY_SLOPE * x)


def _sanitize(x):
    bad = jnp.isnan(x) | jnp.isinf(x)
    return jnp.where(bad, jnp.zeros_like(x), x)


def _dot(a, b):
    return jnp.dot(a, b, preferred_element_type=jnp.float32)


# ---------------------------------------------------------------------------
# Static layouts (shared by init packing, the kernel and the wrapper)
# ---------------------------------------------------------------------------
def _param_layout(T, L, H, Ph):
    """Row offsets of every parameter block inside the single packed slab."""
    pieces = [
        ("logits", T, T),
        ("emb_w1", 2 * T, H), ("emb_b1", 1, H),
        ("emb_w2", H, H), ("emb_b2", 1, H),
        ("emb_hw", H, 2 * T), ("emb_hb", 1, 2 * T),
        ("qc_w1", L, H), ("qc_b1", 1, H),
        ("qc_w2", H, H), ("qc_b2", 1, H),
        ("qc_hw", H, 2 * L), ("qc_hb", 1, 2 * L),
        ("bas_w1", Ph + T + L, H), ("bas_b1", 1, H),
        ("bas_w2", H, H), ("bas_b2", 1, H),
        ("bas_hw", H, 2 * L), ("bas_hb", 1, 2 * L),
    ]
    layout, off, width = {}, 0, 0
    for name, r, c in pieces:
        layout[name] = (off, r, c)
        off += _pad8(r)
        width = max(width, c)
    return layout, off, width


def _noise_layout(P, N, T, L, Q):
    """Row offsets of the noise blocks inside the single packed noise slab."""
    width = max(T, P * L, L)
    g = 0                       # (P*T, T)   logistic noise for the mask
    e = _pad8(P * T)            # (P*T, T)   normal noise for E
    qc = e + _pad8(P * T)       # (Q, P*L)   normal noise for qc_E (lane-stacked)
    z = qc + _pad8(Q)           # (P*N, L)   normal noise for z_basal
    rows = z + _pad8(P * N)
    return {"g": g, "e": e, "qc": qc, "z": z, "rows": rows, "width": width}


def _out_layout(P, N, T, L, Q):
    """Row offsets of the result blocks inside the single lane-dense output."""
    r_emb = 0                               # (P*T): mask | e_mean|e_std | E
    r_qc = _pad8(P * T)                     # (Q)  : qc_E (lane-stacked) | qc mean|std
    r_z = r_qc + _pad8(Q)                   # (P*N): z mean|std | z | zcf mean|std
    rows = r_z + _pad8(P * N)
    width = _pad128(max(4 * T, P * L + 2 * L, 5 * L))
    return {"emb": r_emb, "qc": r_qc, "z": r_z, "rows": rows, "width": width}


# ---------------------------------------------------------------------------
# Fused guide kernel (single invocation, no grid — everything stays in VMEM)
# ---------------------------------------------------------------------------
def fused_guide_kernel(params_ref, noise_ref, data_ref, out_ref,
                       dme_s, qlat_s, *,
                       P, N, T, L, Q, Ph, H, player, nlay, olay):
    PT, PN = P * T, P * N

    def getp(name):
        off, r, c = player[name]
        return params_ref[off:off + r, 0:c]

    def heads(h, wname, bname, out):
        # fused mean|log-var head; output stays lane-packed as mean|std
        ms = _dot(h, getp(wname)) + getp(bname)                  # (rows, 2*out)
        lane = jax.lax.broadcasted_iota(jnp.int32, ms.shape, 1)
        std = jnp.sqrt(jnp.exp(jnp.minimum(ms, LOGVAR_CLAMP)) + VAR_EPS)
        return jnp.where(lane >= out, std, ms)                   # mean | std

    # ---- Gumbel-Softmax (RelaxedBernoulli) hard mask sample ------------------
    # sigmoid((logits + g)/temp) > 0.5  <=>  logits + g > 0   (temp > 0)
    logits = _sanitize(getp("logits"))                           # (T, T)
    gn = noise_ref[nlay["g"]:nlay["g"] + PT, 0:T].reshape(P, T, T)
    mask = ((logits[None, :, :] + gn) > 0.0).astype(jnp.float32)
    mask = mask.reshape(PT, T)                                   # (PT, T)
    # TODO(synk): forward value only; the straight-through gradient estimator
    # (relaxed + stop_grad(hard - relaxed)) is needed if this is differentiated.

    # ---- embedding encoder (input = [mask | one_hot]) ------------------------
    # one_hot is the identity, so identity @ W1[T:2T] == W1[T:2T]
    e_w1 = getp("emb_w1")                                        # (2T, H)
    onehot_plus_b = e_w1[T:2 * T, :] + getp("emb_b1")            # (T, H)
    h = _dot(mask, e_w1[0:T, :]).reshape(P, T, H) + onehot_plus_b[None]
    h = _leaky_relu(h.reshape(PT, H))
    h = _leaky_relu(_dot(h, getp("emb_w2")) + getp("emb_b2"))
    ms_e = heads(h, "emb_hw", "emb_hb", T)                       # (PT, 2T) mean|std
    e_noise = noise_ref[nlay["e"]:nlay["e"] + PT, 0:T]
    E = ms_e[:, 0:T] + ms_e[:, T:2 * T] * e_noise                # (PT, T)
    r0 = olay["emb"]
    out_ref[r0:r0 + PT, 0:T] = mask
    out_ref[r0:r0 + PT, T:3 * T] = ms_e
    out_ref[r0:r0 + PT, 3 * T:4 * T] = E

    # ---- qc encoder (input is a constant ones((Q, L)) buffer -> single row) --
    ones_row = jnp.ones((1, L), jnp.float32)
    h = _leaky_relu(_dot(ones_row, getp("qc_w1")) + getp("qc_b1"))
    h = _leaky_relu(_dot(h, getp("qc_w2")) + getp("qc_b2"))
    ms_qc = heads(h, "qc_hw", "qc_hb", L)                        # (1, 2L) mean|std
    qc_noise = noise_ref[nlay["qc"]:nlay["qc"] + Q, 0:P * L]     # (Q, P*L)
    mean_t = jnp.tile(ms_qc[:, 0:L], (1, P))                     # (1, P*L)
    std_t = jnp.tile(ms_qc[:, L:2 * L], (1, P))
    qcE = mean_t + std_t * qc_noise                              # (Q, P*L) lane-stacked
    r1 = olay["qc"]
    out_ref[r1:r1 + Q, 0:P * L] = qcE
    out_ref[r1:r1 + Q, P * L:P * L + 2 * L] = jnp.broadcast_to(ms_qc, (Q, 2 * L))

    # ---- z_basal encoder (factual + counterfactual, batched) -----------------
    x = data_ref[:, 0:Ph]
    d = data_ref[:, Ph:Ph + T]
    qcv = data_ref[:, Ph + T:Ph + T + Q]

    b_w1 = getp("bas_w1")                                        # (Ph+T+L, H)
    x_h = _dot(x, b_w1[0:Ph, :]) + getp("bas_b1")                # (N, H), shared

    # D @ (mask*E): P tiny matmuls into scratch, then ONE (PN,T)@(T,H) matmul
    ME = mask * E                                                # (PT, T)
    for p in range(P):                                           # P static & tiny
        dme_s[p * N:(p + 1) * N, :] = _dot(d, ME[p * T:(p + 1) * T, :])
    d_h = _dot(dme_s[...], b_w1[Ph:Ph + T, :])                   # (PN, H)

    # qc offsets: ONE (2N,Q)@(Q,P*L) matmul, lane-slices into row scratch,
    # then ONE (2PN,L)@(L,H) matmul
    qc_both = jnp.concatenate([qcv, 1.0 - qcv], axis=0)          # (2N, Q)
    qc_off = _dot(qc_both, qcE)                                  # (2N, P*L)
    for p in range(P):
        qlat_s[p * N:(p + 1) * N, :] = qc_off[0:N, p * L:(p + 1) * L]
        qlat_s[PN + p * N:PN + (p + 1) * N, :] = qc_off[N:2 * N, p * L:(p + 1) * L]
    qc_h = _dot(qlat_s[...], b_w1[Ph + T:Ph + T + L, :])         # (2PN, H)

    base = (d_h.reshape(P, N, H) + x_h[None]).reshape(PN, H)     # (PN, H)
    h = _leaky_relu((qc_h.reshape(2, PN, H) + base[None]).reshape(2 * PN, H))
    h = _leaky_relu(_dot(h, getp("bas_w2")) + getp("bas_b2"))
    ms_z = heads(h, "bas_hw", "bas_hb", L)                       # (2PN, 2L)
    z_noise = noise_ref[nlay["z"]:nlay["z"] + PN, 0:L]
    z = ms_z[0:PN, 0:L] + ms_z[0:PN, L:2 * L] * z_noise          # (PN, L)
    r2 = olay["z"]
    out_ref[r2:r2 + PN, 0:2 * L] = ms_z[0:PN, :]                 # z mean|std
    out_ref[r2:r2 + PN, 2 * L:3 * L] = z                         # z sample
    out_ref[r2:r2 + PN, 3 * L:5 * L] = ms_z[PN:2 * PN, :]        # zcf mean|std


# ---------------------------------------------------------------------------
# Parameter construction (deterministic; mirrors the module __init__ shapes)
# ---------------------------------------------------------------------------
def _linear_init(key, fan_in, fan_out):
    kw, kb = jax.random.split(key)
    bound = 1.0 / math.sqrt(fan_in)
    w = jax.random.uniform(kw, (fan_in, fan_out), jnp.float32, -bound, bound)
    b = jax.random.uniform(kb, (1, fan_out), jnp.float32, -bound, bound)
    return w, b


def init_params(key, n_latent, n_treatments, n_phenos, n_qc, n_hidden, mask_init=0.0):
    del n_qc  # qc_encoder_input is an all-ones buffer, not a parameter
    T, L, H, Ph = n_treatments, n_latent, n_hidden, n_phenos
    keys = jax.random.split(key, 12)
    p = {"q_mask_logits": mask_init * jnp.ones((T, T), jnp.float32)}

    def encoder(ks, n_in, n_out, prefix):
        w1, b1 = _linear_init(ks[0], n_in, H)
        w2, b2 = _linear_init(ks[1], H, H)
        wm, bm = _linear_init(ks[2], H, n_out)
        wv, bv = _linear_init(ks[3], H, n_out)
        # raw weights kept for the pure-JAX reference check
        p.update({f"{prefix}_w1": w1, f"{prefix}_b1": b1, f"{prefix}_w2": w2,
                  f"{prefix}_b2": b2, f"{prefix}_wm": wm, f"{prefix}_bm": bm,
                  f"{prefix}_wv": wv, f"{prefix}_bv": bv})

    encoder(keys[0:4], 2 * T, T, "emb")          # embedding_encoder
    encoder(keys[4:8], L, L, "qc")               # qc_encoder
    encoder(keys[8:12], Ph + T + L, L, "bas")    # z_basal_encoder

    # one packed parameter slab -> single weight DMA per kernel call
    layout, rows, width = _param_layout(T, L, H, Ph)
    slab = jnp.zeros((rows, width), jnp.float32)

    def put(slab, name, arr):
        off, r, c = layout[name]
        return slab.at[off:off + r, 0:c].set(arr.astype(jnp.float32))

    slab = put(slab, "logits", p["q_mask_logits"])
    for pfx in ("emb", "qc", "bas"):
        slab = put(slab, f"{pfx}_w1", p[f"{pfx}_w1"])
        slab = put(slab, f"{pfx}_b1", p[f"{pfx}_b1"])
        slab = put(slab, f"{pfx}_w2", p[f"{pfx}_w2"])
        slab = put(slab, f"{pfx}_b2", p[f"{pfx}_b2"])
        slab = put(slab, f"{pfx}_hw",
                   jnp.concatenate([p[f"{pfx}_wm"], p[f"{pfx}_wv"]], axis=1))
        slab = put(slab, f"{pfx}_hb",
                   jnp.concatenate([p[f"{pfx}_bm"], p[f"{pfx}_bv"]], axis=1))
    p["param_slab"] = slab
    return p


def _sample_noise_packed(key, P, N, T, L, Q):
    """All noise in one packed slab (one DMA); layout given by _noise_layout."""
    lay = _noise_layout(P, N, T, L, Q)
    kg, kn = jax.random.split(key)
    rg = lay["e"]                                   # rows of the gumbel block
    u = jax.random.uniform(kg, (rg, lay["width"]), jnp.float32, 1e-6, 1.0 - 1e-6)
    gumbel = jnp.log(u) - jnp.log1p(-u)             # logistic noise (RelaxedBernoulli)
    normal = jax.random.normal(kn, (lay["rows"] - rg, lay["width"]), jnp.float32)
    return jnp.concatenate([gumbel, normal], axis=0)


# ---------------------------------------------------------------------------
# Full forward pass (knowledge_path=None, logits, mean_field_encoder=False,
# basal_encoder_input_normalization=None, no condition_values)
# ---------------------------------------------------------------------------
@functools.partial(jax.jit, static_argnames=("n_particles", "gs_temperature"))
def guide_forward(params, X, D, qc, key, n_particles, gs_temperature=1.0):
    assert gs_temperature > 0
    T = params["q_mask_logits"].shape[0]
    H = params["emb_w2"].shape[0]
    L = params["qc_wm"].shape[1]
    N, Ph = X.shape
    Q = qc.shape[1]
    P = n_particles

    player, _, _ = _param_layout(T, L, H, Ph)
    nlay = _noise_layout(P, N, T, L, Q)
    olay = _out_layout(P, N, T, L, Q)

    noise = _sample_noise_packed(key, P, N, T, L, Q)
    data = jnp.concatenate([X.astype(jnp.float32), D.astype(jnp.float32),
                            qc.astype(jnp.float32)], axis=1)     # (N, Ph+T+Q)

    out = pl.pallas_call(
        functools.partial(fused_guide_kernel, P=P, N=N, T=T, L=L, Q=Q, Ph=Ph, H=H,
                          player=player, nlay=nlay, olay=olay),
        out_shape=jax.ShapeDtypeStruct((olay["rows"], olay["width"]), jnp.float32),
        scratch_shapes=[pltpu.VMEM((P * N, T), jnp.float32),       # D@(mask*E)
                        pltpu.VMEM((2 * P * N, L), jnp.float32)],  # qc offsets fac|cf
        # TODO(synk): at production N / P, tile the z_basal path over N with a
        # grid + dimension_semantics=("parallel",) so both v7x TCs are used and
        # VMEM stays within the 64 MiB v7x budget.
    )(params["param_slab"], noise, data)

    # ---- unpack the single lane-dense output slab (cheap XLA slices) ---------
    PT, PN = P * T, P * N
    emb = out[0:PT, :]
    mask = emb[:, 0:T].reshape(P, T, T)
    e_mean = emb[:, T:2 * T].reshape(P, T, T)
    e_std = emb[:, 2 * T:3 * T].reshape(P, T, T)
    E = emb[:, 3 * T:4 * T].reshape(P, T, T)

    r1 = olay["qc"]
    qc_blk = out[r1:r1 + Q, :]
    qcE = qc_blk[:, 0:P * L].reshape(Q, P, L).transpose(1, 0, 2)
    qce_mean = jnp.broadcast_to(qc_blk[0:1, P * L:P * L + L][None], (P, Q, L))
    qce_std = jnp.broadcast_to(qc_blk[0:1, P * L + L:P * L + 2 * L][None], (P, Q, L))

    r2 = olay["z"]
    zb = out[r2:r2 + PN, :]
    z_mean = zb[:, 0:L].reshape(P, N, L)
    z_std = zb[:, L:2 * L].reshape(P, N, L)
    z_basal = zb[:, 2 * L:3 * L].reshape(P, N, L)
    zcf_mean = zb[:, 3 * L:4 * L].reshape(P, N, L)
    zcf_std = zb[:, 4 * L:5 * L].reshape(P, N, L)

    guide_distributions = {
        "q_mask": {"logits": _sanitize(params["q_mask_logits"]),
                   "temperature": jnp.full((1,), gs_temperature, jnp.float32)},
        "q_E": {"loc": e_mean, "scale": e_std},
        "q_qc_E": {"loc": qce_mean, "scale": qce_std},
        "q_z_cf_basal": {"loc": zcf_mean, "scale": zcf_std},
        "q_z_basal": {"loc": z_mean, "scale": z_std},
    }
    guide_samples = {"mask": mask, "E": E, "qc_E": qcE, "z_basal": z_basal}
    # TODO(synk): condition_values overrides, normalization_module and
    # mean_field_encoder=True paths are not exercised (module defaults) and are
    # therefore not implemented here.
    return guide_distributions, guide_samples


# ---------------------------------------------------------------------------
# Pure-JAX reference of the PyTorch forward (validation only)
# ---------------------------------------------------------------------------
def guide_forward_reference(params, X, D, qc, key, n_particles, gs_temperature=1.0):
    T = params["q_mask_logits"].shape[0]
    L = params["qc_wm"].shape[1]
    N, Ph = X.shape
    Q = qc.shape[1]
    P = n_particles
    nlay = _noise_layout(P, N, T, L, Q)
    noise = _sample_noise_packed(key, P, N, T, L, Q)
    gn = noise[nlay["g"]:nlay["g"] + P * T, 0:T].reshape(P, T, T)
    en = noise[nlay["e"]:nlay["e"] + P * T, 0:T].reshape(P, T, T)
    qcn = noise[nlay["qc"]:nlay["qc"] + Q, 0:P * L].reshape(Q, P, L).transpose(1, 0, 2)
    zn = noise[nlay["z"]:nlay["z"] + P * N, 0:L].reshape(P, N, L)

    def mlp(x, pfx):
        h = _leaky_relu(x @ params[f"{pfx}_w1"] + params[f"{pfx}_b1"])
        h = _leaky_relu(h @ params[f"{pfx}_w2"] + params[f"{pfx}_b2"])
        mean = h @ params[f"{pfx}_wm"] + params[f"{pfx}_bm"]
        lv = jnp.minimum(h @ params[f"{pfx}_wv"] + params[f"{pfx}_bv"], LOGVAR_CLAMP)
        return mean, jnp.sqrt(jnp.exp(lv) + VAR_EPS)

    logits = _sanitize(params["q_mask_logits"])
    relaxed = jax.nn.sigmoid((logits[None] + gn) / gs_temperature)
    mask = (relaxed > 0.5).astype(jnp.float32)

    one_hot = jnp.broadcast_to(jnp.eye(T, dtype=jnp.float32), (P, T, T))
    e_mean, e_std = mlp(jnp.concatenate([mask, one_hot], axis=-1), "emb")
    E = e_mean + e_std * en

    qce_mean, qce_std = mlp(jnp.ones((P, Q, L), jnp.float32), "qc")
    qcE = qce_mean + qce_std * qcn

    latent_offset = jnp.matmul(D, mask * E)            # (P, N, T)
    latent_qc = jnp.matmul(qc, qcE)                    # (P, N, L)
    latent_qc_cf = jnp.matmul(1.0 - qc, qcE)
    Xp = jnp.broadcast_to(X, (P, N, Ph))
    z_mean, z_std = mlp(jnp.concatenate([Xp, latent_offset, latent_qc], axis=-1), "bas")
    zcf_mean, zcf_std = mlp(jnp.concatenate([Xp, latent_offset, latent_qc_cf], axis=-1), "bas")
    z = z_mean + z_std * zn

    dists = {
        "q_mask": {"logits": logits,
                   "temperature": jnp.full((1,), gs_temperature, jnp.float32)},
        "q_E": {"loc": e_mean, "scale": e_std},
        "q_qc_E": {"loc": qce_mean, "scale": qce_std},
        "q_z_cf_basal": {"loc": zcf_mean, "scale": zcf_std},
        "q_z_basal": {"loc": z_mean, "scale": z_std},
    }
    samples = {"mask": mask, "E": E, "qc_E": qcE, "z_basal": z}
    return dists, samples


if __name__ == "__main__":
    n_latent = 16
    n_treatments = 16
    n_phenos = 32
    n_qc = 8
    n_hidden = 32      # basal_encoder_n_hidden == embedding_encoder_n_hidden
    N = 8              # batch size
    n_particles = 2

    root = jax.random.PRNGKey(0)
    k_param, k_data, k_sample = jax.random.split(root, 3)
    params = init_params(k_param, n_latent, n_treatments, n_phenos, n_qc, n_hidden)

    kx, kd, kq = jax.random.split(k_data, 3)
    X = jax.random.normal(kx, (N, n_phenos), jnp.float32)
    D = (jax.random.uniform(kd, (N, n_treatments)) < 0.2).astype(jnp.float32)
    qc = (jax.random.uniform(kq, (N, n_qc)) < 0.5).astype(jnp.float32)

    dists, samples = guide_forward(params, X, D, qc, k_sample,
                                   n_particles=n_particles)
    jax.block_until_ready((dists, samples))

    # shape / sanity checks
    assert samples["mask"].shape == (n_particles, n_treatments, n_treatments)
    assert samples["E"].shape == (n_particles, n_treatments, n_treatments)
    assert samples["qc_E"].shape == (n_particles, n_qc, n_latent)
    assert samples["z_basal"].shape == (n_particles, N, n_latent)
    assert dists["q_z_basal"]["loc"].shape == (n_particles, N, n_latent)
    assert dists["q_z_cf_basal"]["scale"].shape == (n_particles, N, n_latent)
    for leaf in jax.tree_util.tree_leaves((dists, samples)):
        assert bool(jnp.all(jnp.isfinite(leaf)))
    m = samples["mask"]
    assert bool(jnp.all((m == 0.0) | (m == 1.0)))   # hard straight-through value

    # correctness vs. a pure-JAX reference of the PyTorch forward
    ref_dists, ref_samples = guide_forward_reference(
        params, X, D, qc, k_sample, n_particles=n_particles)
    np.testing.assert_array_equal(np.asarray(samples["mask"]),
                                  np.asarray(ref_samples["mask"]))
    for name in ("E", "qc_E", "z_basal"):
        np.testing.assert_allclose(np.asarray(samples[name]),
                                   np.asarray(ref_samples[name]),
                                   rtol=2e-2, atol=2e-2)
    for dname in ("q_E", "q_qc_E", "q_z_basal", "q_z_cf_basal"):
        for field in ("loc", "scale"):
            np.testing.assert_allclose(np.asarray(dists[dname][field]),
                                       np.asarray(ref_dists[dname][field]),
                                       rtol=2e-2, atol=2e-2)

    print("KERNEL_OK")
</pallas_src>

<mosaic_0001>
module attributes {stable_mosaic.version = 11 : i64} {
  func.func @fused_guide_kernel(%arg0: memref<392x32xf32, #tpu.memory_space<vmem>>, %arg1: memref<88x32xf32, #tpu.memory_space<vmem>>, %arg2: memref<8x56xf32, #tpu.memory_space<vmem>>, %arg3: memref<56x128xf32, #tpu.memory_space<vmem>>, %arg4: memref<16x16xf32, #tpu.memory_space<vmem>>, %arg5: memref<32x16xf32, #tpu.memory_space<vmem>>) attributes {dimension_semantics = [], scalar_prefetch = 0 : i64, scratch_operands = 2 : i64, tpu.core_type = #tpu.core_type<tc>} {
    %c0 = arith.constant 0 : index
    %c0_0 = arith.constant 0 : index
    %0 = vector.load %arg0[%c0, %c0_0] : memref<392x32xf32, #tpu.memory_space<vmem>>, vector<16x16xf32>
    %1 = arith.cmpf one, %0, %0 : vector<16x16xf32>
    %2 = math.absf %0 : vector<16x16xf32>
    %cst = arith.constant 0x7F800000 : f32
    %3 = vector.broadcast %cst : f32 to vector<16x16xf32>
    %4 = arith.cmpf oeq, %2, %3 : vector<16x16xf32>
    %5 = arith.ori %1, %4 : vector<16x16xi1>
    %cst_1 = arith.constant 0.000000e+00 : f32
    %6 = vector.broadcast %cst_1 : f32 to vector<16x16xf32>
    %7 = arith.select %5, %6, %0 : vector<16x16xi1>, vector<16x16xf32>
    %c0_2 = arith.constant 0 : index
    %c0_3 = arith.constant 0 : index
    %8 = vector.load %arg1[%c0_2, %c0_3] : memref<88x32xf32, #tpu.memory_space<vmem>>, vector<32x16xf32>
    %9 = vector.shape_cast %8 : vector<32x16xf32> to vector<2x16x16xf32>
    %10 = vector.shape_cast %7 : vector<16x16xf32> to vector<1x16x16xf32>
    %11 = vector.broadcast %10 : vector<1x16x16xf32> to vector<2x16x16xf32>
    %12 = arith.addf %11, %9 : vector<2x16x16xf32>
    %cst_4 = arith.constant 0.000000e+00 : f32
    %13 = vector.broadcast %cst_4 : f32 to vector<2x16x16xf32>
    %14 = arith.cmpf ogt, %12, %13 : vector<2x16x16xf32>
    %15 = arith.extui %14 : vector<2x16x16xi1> to vector<2x16x16xi32>
    %16 = arith.sitofp %15 : vector<2x16x16xi32> to vector<2x16x16xf32>
    %17 = vector.shape_cast %16 : vector<2x16x16xf32> to vector<32x16xf32>
    %c16 = arith.constant 16 : index
    %c0_5 = arith.constant 0 : index
    %18 = vector.load %arg0[%c16, %c0_5] : memref<392x32xf32, #tpu.memory_space<vmem>>, vector<32x32xf32>
    %19 = vector.extract_strided_slice %18 {offsets = [16, 0], sizes = [16, 32], strides = [1, 1]} : vector<32x32xf32> to vector<16x32xf32>
    %c48 = arith.constant 48 : index
    %c0_6 = arith.constant 0 : index
    %20 = vector.load %arg0[%c48, %c0_6] : memref<392x32xf32, #tpu.memory_space<vmem>>, vector<1x32xf32>
    %21 = vector.broadcast %20 : vector<1x32xf32> to vector<16x32xf32>
    %22 = arith.addf %19, %21 : vector<16x32xf32>
    %23 = vector.extract_strided_slice %18 {offsets = [0, 0], sizes = [16, 32], strides = [1, 1]} : vector<32x32xf32> to vector<16x32xf32>
    %cst_7 = arith.constant dense<0.000000e+00> : vector<32x32xf32>
    %24 = tpu.matmul %17, %23, %cst_7 {dimension_numbers = #tpu.dot_dimension_numbers<[1], [0], [0], [1], [0, 0, 1, 1], [], []>} : vector<32x16xf32>, vector<16x32xf32>, vector<32x32xf32> -> vector<32x32xf32>
    %25 = vector.shape_cast %24 : vector<32x32xf32> to vector<2x16x32xf32>
    %26 = vector.shape_cast %22 : vector<16x32xf32> to vector<1x16x32xf32>
    %27 = vector.broadcast %26 : vector<1x16x32xf32> to vector<2x16x32xf32>
    %28 = arith.addf %25, %27 : vector<2x16x32xf32>
    %29 = vector.shape_cast %28 : vector<2x16x32xf32> to vector<32x32xf32>
    %cst_8 = arith.constant 0.000000e+00 : f32
    %30 = vector.broadcast %cst_8 : f32 to vector<32x32xf32>
    %31 = arith.cmpf ogt, %29, %30 : vector<32x32xf32>
    %cst_9 = arith.constant 0.00999999977 : f32
    %32 = vector.broadcast %cst_9 : f32 to vector<32x32xf32>
    %33 = arith.mulf %32, %29 : vector<32x32xf32>
    %34 = arith.select %31, %29, %33 : vector<32x32xi1>, vector<32x32xf32>
    %c56 = arith.constant 56 : index
    %c0_10 = arith.constant 0 : index
    %35 = vector.load %arg0[%c56, %c0_10] : memref<392x32xf32, #tpu.memory_space<vmem>>, vector<32x32xf32>
    %cst_11 = arith.constant dense<0.000000e+00> : vector<32x32xf32>
    %36 = tpu.matmul %34, %35, %cst_11 {dimension_numbers = #tpu.dot_dimension_numbers<[1], [0], [0], [1], [0, 0, 1, 1], [], []>} : vector<32x32xf32>, vector<32x32xf32>, vector<32x32xf32> -> vector<32x32xf32>
    %c88 = arith.constant 88 : index
    %c0_12 = arith.constant 0 : index
    %37 = vector.load %arg0[%c88, %c0_12] : memref<392x32xf32, #tpu.memory_space<vmem>>, vector<1x32xf32>
    %38 = vector.broadcast %37 : vector<1x32xf32> to vector<32x32xf32>
    %39 = arith.addf %36, %38 : vector<32x32xf32>
    %cst_13 = arith.constant 0.000000e+00 : f32
    %40 = vector.broadcast %cst_13 : f32 to vector<32x32xf32>
    %41 = arith.cmpf ogt, %39, %40 : vector<32x32xf32>
    %cst_14 = arith.constant 0.00999999977 : f32
    %42 = vector.broadcast %cst_14 : f32 to vector<32x32xf32>
    %43 = arith.mulf %42, %39 : vector<32x32xf32>
    %44 = arith.select %41, %39, %43 : vector<32x32xi1>, vector<32x32xf32>
    %c96 = arith.constant 96 : index
    %c0_15 = arith.constant 0 : index
    %45 = vector.load %arg0[%c96, %c0_15] : memref<392x32xf32, #tpu.memory_space<vmem>>, vector<32x32xf32>
    %cst_16 = arith.constant dense<0.000000e+00> : vector<32x32xf32>
    %46 = tpu.matmul %44, %45, %cst_16 {dimension_numbers = #tpu.dot_dimension_numbers<[1], [0], [0], [1], [0, 0, 1, 1], [], []>} : vector<32x32xf32>, vector<32x32xf32>, vector<32x32xf32> -> vector<32x32xf32>
    %c128 = arith.constant 128 : index
    %c0_17 = arith.constant 0 : index
    %47 = vector.load %arg0[%c128, %c0_17] : memref<392x32xf32, #tpu.memory_space<vmem>>, vector<1x32xf32>
    %48 = vector.broadcast %47 : vector<1x32xf32> to vector<32x32xf32>
    %49 = arith.addf %46, %48 : vector<32x32xf32>
    %50 = tpu.iota {dimensions = array<i32: 1>} : vector<32x32xi32>
    %cst_18 = arith.constant 8.800000e+01 : f32
    %51 = vector.broadcast %cst_18 : f32 to vector<32x32xf32>
    %52 = arith.minimumf %49, %51 : vector<32x32xf32>
    %53 = math.exp %52 : vector<32x32xf32>
    %cst_19 = arith.constant 9.99999974E-5 : f32
    %54 = vector.broadcast %cst_19 : f32 to vector<32x32xf32>
    %55 = arith.addf %53, %54 : vector<32x32xf32>
    %56 = math.sqrt %55 : vector<32x32xf32>
    %c16_i32 = arith.constant 16 : i32
    %57 = vector.broadcast %c16_i32 : i32 to vector<32x32xi32>
    %58 = arith.cmpi sge, %50, %57 : vector<32x32xi32>
    %59 = arith.select %58, %56, %49 : vector<32x32xi1>, vector<32x32xf32>
    %c32 = arith.constant 32 : index
    %c0_20 = arith.constant 0 : index
    %60 = vector.load %arg1[%c32, %c0_20] : memref<88x32xf32, #tpu.memory_space<vmem>>, vector<32x16xf32>
    %61 = vector.extract_strided_slice %59 {offsets = [0, 0], sizes = [32, 16], strides = [1, 1]} : vector<32x32xf32> to vector<32x16xf32>
    %62 = vector.extract_strided_slice %59 {offsets = [0, 16], sizes = [32, 16], strides = [1, 1]} : vector<32x32xf32> to vector<32x16xf32>
    %63 = arith.mulf %62, %60 : vector<32x16xf32>
    %64 = arith.addf %61, %63 : vector<32x16xf32>
    %c0_21 = arith.constant 0 : index
    %c0_22 = arith.constant 0 : index
    %65 = vector.load %arg3[%c0_21, %c0_22] : memref<56x128xf32, #tpu.memory_space<vmem>>, vector<32x16xf32>
    tpu.vector_store %arg3[%c0_21, %c0_22], %17 {strides = array<i32>} : memref<56x128xf32, #tpu.memory_space<vmem>>, vector<32x16xf32>,
    %c0_23 = arith.constant 0 : index
    %c16_24 = arith.constant 16 : index
    %66 = vector.load %arg3[%c0_23, %c16_24] : memref<56x128xf32, #tpu.memory_space<vmem>>, vector<32x32xf32>
    tpu.vector_store %arg3[%c0_23, %c16_24], %59 {strides = array<i32>} : memref<56x128xf32, #tpu.memory_space<vmem>>, vector<32x32xf32>,
    %c0_25 = arith.constant 0 : index
    %c48_26 = arith.constant 48 : index
    %67 = vector.load %arg3[%c0_25, %c48_26] : memref<56x128xf32, #tpu.memory_space<vmem>>, vector<32x16xf32>
    tpu.vector_store %arg3[%c0_25, %c48_26], %64 {strides = array<i32>} : memref<56x128xf32, #tpu.memory_space<vmem>>, vector<32x16xf32>,
    %cst_27 = arith.constant 1.000000e+00 : f32
    %68 = vector.broadcast %cst_27 : f32 to vector<1x16xf32>
    %c136 = arith.constant 136 : index
    %c0_28 = arith.constant 0 : index
    %69 = vector.load %arg0[%c136, %c0_28] : memref<392x32xf32, #tpu.memory_space<vmem>>, vector<16x32xf32>
    %cst_29 = arith.constant dense<0.000000e+00> : vector<1x32xf32>
    %70 = tpu.matmul %68, %69, %cst_29 {dimension_numbers = #tpu.dot_dimension_numbers<[1], [0], [0], [1], [0, 0, 1, 1], [], []>} : vector<1x16xf32>, vector<16x32xf32>, vector<1x32xf32> -> vector<1x32xf32>
    %c152 = arith.constant 152 : index
    %c0_30 = arith.constant 0 : index
    %71 = vector.load %arg0[%c152, %c0_30] : memref<392x32xf32, #tpu.memory_space<vmem>>, vector<1x32xf32>
    %72 = arith.addf %70, %71 : vector<1x32xf32>
    %cst_31 = arith.constant 0.000000e+00 : f32
    %73 = vector.broadcast %cst_31 : f32 to vector<1x32xf32>
    %74 = arith.cmpf ogt, %72, %73 : vector<1x32xf32>
    %cst_32 = arith.constant 0.00999999977 : f32
    %75 = vector.broadcast %cst_32 : f32 to vector<1x32xf32>
    %76 = arith.mulf %75, %72 : vector<1x32xf32>
    %77 = arith.select %74, %72, %76 : vector<1x32xi1>, vector<1x32xf32>
    %c160 = arith.constant 160 : index
    %c0_33 = arith.constant 0 : index
    %78 = vector.load %arg0[%c160, %c0_33] : memref<392x32xf32, #tpu.memory_space<vmem>>, vector<32x32xf32>
    %cst_34 = arith.constant dense<0.000000e+00> : vector<1x32xf32>
    %79 = tpu.matmul %77, %78, %cst_34 {dimension_numbers = #tpu.dot_dimension_numbers<[1], [0], [0], [1], [0, 0, 1, 1], [], []>} : vector<1x32xf32>, vector<32x32xf32>, vector<1x32xf32> -> vector<1x32xf32>
    %c192 = arith.constant 192 : index
    %c0_35 = arith.constant 0 : index
    %80 = vector.load %arg0[%c192, %c0_35] : memref<392x32xf32, #tpu.memory_space<vmem>>, vector<1x32xf32>
    %81 = arith.addf %79, %80 : vector<1x32xf32>
    %cst_36 = arith.constant 0.000000e+00 : f32
    %82 = vector.broadcast %cst_36 : f32 to vector<1x32xf32>
    %83 = arith.cmpf ogt, %81, %82 : vector<1x32xf32>
    %cst_37 = arith.constant 0.00999999977 : f32
    %84 = vector.broadcast %cst_37 : f32 to vector<1x32xf32>
    %85 = arith.mulf %84, %81 : vector<1x32xf32>
    %86 = arith.select %83, %81, %85 : vector<1x32xi1>, vector<1x32xf32>
    %c200 = arith.constant 200 : index
    %c0_38 = arith.constant 0 : index
    %87 = vector.load %arg0[%c200, %c0_38] : memref<392x32xf32, #tpu.memory_space<vmem>>, vector<32x32xf32>
    %cst_39 = arith.constant dense<0.000000e+00> : vector<1x32xf32>
    %88 = tpu.matmul %86, %87, %cst_39 {dimension_numbers = #tpu.dot_dimension_numbers<[1], [0], [0], [1], [0, 0, 1, 1], [], []>} : vector<1x32xf32>, vector<32x32xf32>, vector<1x32xf32> -> vector<1x32xf32>
    %c232 = arith.constant 232 : index
    %c0_40 = arith.constant 0 : index
    %89 = vector.load %arg0[%c232, %c0_40] : memref<392x32xf32, #tpu.memory_space<vmem>>, vector<1x32xf32>
    %90 = arith.addf %88, %89 : vector<1x32xf32>
    %91 = tpu.iota {dimensions = array<i32: 1>} : vector<1x32xi32>
    %cst_41 = arith.constant 8.800000e+01 : f32
    %92 = vector.broadcast %cst_41 : f32 to vector<1x32xf32>
    %93 = arith.minimumf %90, %92 : vector<1x32xf32>
    %94 = math.exp %93 : vector<1x32xf32>
    %cst_42 = arith.constant 9.99999974E-5 : f32
    %95 = vector.broadcast %cst_42 : f32 to vector<1x32xf32>
    %96 = arith.addf %94, %95 : vector<1x32xf32>
    %97 = math.sqrt %96 : vector<1x32xf32>
    %c16_i32_43 = arith.constant 16 : i32
    %98 = vector.broadcast %c16_i32_43 : i32 to vector<1x32xi32>
    %99 = arith.cmpi sge, %91, %98 : vector<1x32xi32>
    %100 = arith.select %99, %97, %90 : vector<1x32xi1>, vector<1x32xf32>
    %c64 = arith.constant 64 : index
    %c0_44 = arith.constant 0 : index
    %101 = vector.load %arg1[%c64, %c0_44] : memref<88x32xf32, #tpu.memory_space<vmem>>, vector<8x32xf32>
    %102 = vector.extract_strided_slice %100 {offsets = [0, 0], sizes = [1, 16], strides = [1, 1]} : vector<1x32xf32> to vector<1x16xf32>
    %103 = tpu.concatenate %102, %102 in 1 : vector<1x16xf32>, vector<1x16xf32> -> vector<1x32xf32>
    %104 = vector.extract_strided_slice %100 {offsets = [0, 16], sizes = [1, 16], strides = [1, 1]} : vector<1x32xf32> to vector<1x16xf32>
    %105 = tpu.concatenate %104, %104 in 1 : vector<1x16xf32>, vector<1x16xf32> -> vector<1x32xf32>
    %106 = vector.broadcast %105 : vector<1x32xf32> to vector<8x32xf32>
    %107 = arith.mulf %106, %101 : vector<8x32xf32>
    %108 = vector.broadcast %103 : vector<1x32xf32> to vector<8x32xf32>
    %109 = arith.addf %108, %107 : vector<8x32xf32>
    %c32_45 = arith.constant 32 : index
    %c0_46 = arith.constant 0 : index
    %110 = vector.load %arg3[%c32_45, %c0_46] : memref<56x128xf32, #tpu.memory_space<vmem>>, vector<8x32xf32>
    tpu.vector_store %arg3[%c32_45, %c0_46], %109 {strides = array<i32>} : memref<56x128xf32, #tpu.memory_space<vmem>>, vector<8x32xf32>,
    %111 = vector.shape_cast %100 : vector<1x32xf32> to vector<1x32xf32>
    %112 = vector.broadcast %111 : vector<1x32xf32> to vector<8x32xf32>
    %c32_47 = arith.constant 32 : index
    %c32_48 = arith.constant 32 : index
    %113 = vector.load %arg3[%c32_47, %c32_48] : memref<56x128xf32, #tpu.memory_space<vmem>>, vector<8x32xf32>
    tpu.vector_store %arg3[%c32_47, %c32_48], %112 {strides = array<i32>} : memref<56x128xf32, #tpu.memory_space<vmem>>, vector<8x32xf32>,
    %c0_49 = arith.constant 0 : index
    %c0_50 = arith.constant 0 : index
    %114 = vector.load %arg2[%c0_49, %c0_50] : memref<8x56xf32, #tpu.memory_space<vmem>>, vector<8x32xf32>
    %c0_51 = arith.constant 0 : index
    %c32_52 = arith.constant 32 : index
    %115 = vector.load %arg2[%c0_51, %c32_52] : memref<8x56xf32, #tpu.memory_space<vmem>>, vector<8x16xf32>
    %c0_53 = arith.constant 0 : index
    %c48_54 = arith.constant 48 : index
    %116 = vector.load %arg2[%c0_53, %c48_54] : memref<8x56xf32, #tpu.memory_space<vmem>>, vector<8x8xf32>
    %c240 = arith.constant 240 : index
    %c0_55 = arith.constant 0 : index
    %117 = vector.load %arg0[%c240, %c0_55] : memref<392x32xf32, #tpu.memory_space<vmem>>, vector<64x32xf32>
    %118 = vector.extract_strided_slice %117 {offsets = [0, 0], sizes = [32, 32], strides = [1, 1]} : vector<64x32xf32> to vector<32x32xf32>
    %cst_56 = arith.constant dense<0.000000e+00> : vector<8x32xf32>
    %119 = tpu.matmul %114, %118, %cst_56 {dimension_numbers = #tpu.dot_dimension_numbers<[1], [0], [0], [1], [0, 0, 1, 1], [], []>} : vector<8x32xf32>, vector<32x32xf32>, vector<8x32xf32> -> vector<8x32xf32>
    %c304 = arith.constant 304 : index
    %c0_57 = arith.constant 0 : index
    %120 = vector.load %arg0[%c304, %c0_57] : memref<392x32xf32, #tpu.memory_space<vmem>>, vector<1x32xf32>
    %121 = vector.broadcast %120 : vector<1x32xf32> to vector<8x32xf32>
    %122 = arith.addf %119, %121 : vector<8x32xf32>
    %123 = arith.mulf %17, %64 : vector<32x16xf32>
    %124 = vector.extract_strided_slice %123 {offsets = [0, 0], sizes = [16, 16], strides = [1, 1]} : vector<32x16xf32> to vector<16x16xf32>
    %cst_58 = arith.constant dense<0.000000e+00> : vector<8x16xf32>
    %125 = tpu.matmul %115, %124, %cst_58 {dimension_numbers = #tpu.dot_dimension_numbers<[1], [0], [0], [1], [0, 0, 1, 1], [], []>} : vector<8x16xf32>, vector<16x16xf32>, vector<8x16xf32> -> vector<8x16xf32>
    %c0_59 = arith.constant 0 : index
    %c0_60 = arith.constant 0 : index
    %126 = vector.load %arg4[%c0_59, %c0_60] : memref<16x16xf32, #tpu.memory_space<vmem>>, vector<8x16xf32>
    tpu.vector_store %arg4[%c0_59, %c0_60], %125 {strides = array<i32>} : memref<16x16xf32, #tpu.memory_space<vmem>>, vector<8x16xf32>,
    %127 = vector.extract_strided_slice %123 {offsets = [16, 0], sizes = [16, 16], strides = [1, 1]} : vector<32x16xf32> to vector<16x16xf32>
    %cst_61 = arith.constant dense<0.000000e+00> : vector<8x16xf32>
    %128 = tpu.matmul %115, %127, %cst_61 {dimension_numbers = #tpu.dot_dimension_numbers<[1], [0], [0], [1], [0, 0, 1, 1], [], []>} : vector<8x16xf32>, vector<16x16xf32>, vector<8x16xf32> -> vector<8x16xf32>
    %c8 = arith.constant 8 : index
    %c0_62 = arith.constant 0 : index
    %129 = vector.load %arg4[%c8, %c0_62] : memref<16x16xf32, #tpu.memory_space<vmem>>, vector<8x16xf32>
    tpu.vector_store %arg4[%c8, %c0_62], %128 {strides = array<i32>} : memref<16x16xf32, #tpu.memory_space<vmem>>, vector<8x16xf32>,
    %c0_63 = arith.constant 0 : index
    %c0_64 = arith.constant 0 : index
    %130 = vector.load %arg4[%c0_63, %c0_64] : memref<16x16xf32, #tpu.memory_space<vmem>>, vector<16x16xf32>
    %131 = vector.extract_strided_slice %117 {offsets = [32, 0], sizes = [16, 32], strides = [1, 1]} : vector<64x32xf32> to vector<16x32xf32>
    %cst_65 = arith.constant dense<0.000000e+00> : vector<16x32xf32>
    %132 = tpu.matmul %130, %131, %cst_65 {dimension_numbers = #tpu.dot_dimension_numbers<[1], [0], [0], [1], [0, 0, 1, 1], [], []>} : vector<16x16xf32>, vector<16x32xf32>, vector<16x32xf32> -> vector<16x32xf32>
    %cst_66 = arith.constant 1.000000e+00 : f32
    %133 = vector.broadcast %cst_66 : f32 to vector<8x8xf32>
    %134 = arith.subf %133, %116 : vector<8x8xf32>
    %135 = tpu.concatenate %116, %134 in 0 : vector<8x8xf32>, vector<8x8xf32> -> vector<16x8xf32>
    %cst_67 = arith.constant dense<0.000000e+00> : vector<16x32xf32>
    %136 = tpu.matmul %135, %109, %cst_67 {dimension_numbers = #tpu.dot_dimension_numbers<[1], [0], [0], [1], [0, 0, 1, 1], [], []>} : vector<16x8xf32>, vector<8x32xf32>, vector<16x32xf32> -> vector<16x32xf32>
    %137 = vector.extract_strided_slice %136 {offsets = [0, 0], sizes = [8, 16], strides = [1, 1]} : vector<16x32xf32> to vector<8x16xf32>
    %c0_68 = arith.constant 0 : index
    %c0_69 = arith.constant 0 : index
    %138 = vector.load %arg5[%c0_68, %c0_69] : memref<32x16xf32, #tpu.memory_space<vmem>>, vector<8x16xf32>
    tpu.vector_store %arg5[%c0_68, %c0_69], %137 {strides = array<i32>} : memref<32x16xf32, #tpu.memory_space<vmem>>, vector<8x16xf32>,
    %139 = vector.extract_strided_slice %136 {offsets = [8, 0], sizes = [8, 16], strides = [1, 1]} : vector<16x32xf32> to vector<8x16xf32>
    %c16_70 = arith.constant 16 : index
    %c0_71 = arith.constant 0 : index
    %140 = vector.load %arg5[%c16_70, %c0_71] : memref<32x16xf32, #tpu.memory_space<vmem>>, vector<8x16xf32>
    tpu.vector_store %arg5[%c16_70, %c0_71], %139 {strides = array<i32>} : memref<32x16xf32, #tpu.memory_space<vmem>>, vector<8x16xf32>,
    %141 = vector.extract_strided_slice %136 {offsets = [0, 16], sizes = [8, 16], strides = [1, 1]} : vector<16x32xf32> to vector<8x16xf32>
    %c8_72 = arith.constant 8 : index
    %c0_73 = arith.constant 0 : index
    %142 = vector.load %arg5[%c8_72, %c0_73] : memref<32x16xf32, #tpu.memory_space<vmem>>, vector<8x16xf32>
    tpu.vector_store %arg5[%c8_72, %c0_73], %141 {strides = array<i32>} : memref<32x16xf32, #tpu.memory_space<vmem>>, vector<8x16xf32>,
    %143 = vector.extract_strided_slice %136 {offsets = [8, 16], sizes = [8, 16], strides = [1, 1]} : vector<16x32xf32> to vector<8x16xf32>
    %c24 = arith.constant 24 : index
    %c0_74 = arith.constant 0 : index
    %144 = vector.load %arg5[%c24, %c0_74] : memref<32x16xf32, #tpu.memory_space<vmem>>, vector<8x16xf32>
    tpu.vector_store %arg5[%c24, %c0_74], %143 {strides = array<i32>} : memref<32x16xf32, #tpu.memory_space<vmem>>, vector<8x16xf32>,
    %c0_75 = arith.constant 0 : index
    %c0_76 = arith.constant 0 : index
    %145 = vector.load %arg5[%c0_75, %c0_76] : memref<32x16xf32, #tpu.memory_space<vmem>>, vector<32x16xf32>
    %146 = vector.extract_strided_slice %117 {offsets = [48, 0], sizes = [16, 32], strides = [1, 1]} : vector<64x32xf32> to vector<16x32xf32>
    %cst_77 = arith.constant dense<0.000000e+00> : vector<32x32xf32>
    %147 = tpu.matmul %145, %146, %cst_77 {dimension_numbers = #tpu.dot_dimension_numbers<[1], [0], [0], [1], [0, 0, 1, 1], [], []>} : vector<32x16xf32>, vector<16x32xf32>, vector<32x32xf32> -> vector<32x32xf32>
    %148 = vector.shape_cast %132 : vector<16x32xf32> to vector<2x8x32xf32>
    %149 = vector.shape_cast %122 : vector<8x32xf32> to vector<1x8x32xf32>
    %150 = vector.broadcast %149 : vector<1x8x32xf32> to vector<2x8x32xf32>
    %151 = arith.addf %148, %150 : vector<2x8x32xf32>
    %152 = vector.shape_cast %151 : vector<2x8x32xf32> to vector<16x32xf32>
    %153 = vector.shape_cast %147 : vector<32x32xf32> to vector<2x16x32xf32>
    %154 = vector.shape_cast %152 : vector<16x32xf32> to vector<1x16x32xf32>
    %155 = vector.broadcast %154 : vector<1x16x32xf32> to vector<2x16x32xf32>
    %156 = arith.addf %153, %155 : vector<2x16x32xf32>
    %157 = vector.shape_cast %156 : vector<2x16x32xf32> to vector<32x32xf32>
    %cst_78 = arith.constant 0.000000e+00 : f32
    %158 = vector.broadcast %cst_78 : f32 to vector<32x32xf32>
    %159 = arith.cmpf ogt, %157, %158 : vector<32x32xf32>
    %cst_79 = arith.constant 0.00999999977 : f32
    %160 = vector.broadcast %cst_79 : f32 to vector<32x32xf32>
    %161 = arith.mulf %160, %157 : vector<32x32xf32>
    %162 = arith.select %159, %157, %161 : vector<32x32xi1>, vector<32x32xf32>
    %c312 = arith.constant 312 : index
    %c0_80 = arith.constant 0 : index
    %163 = vector.load %arg0[%c312, %c0_80] : memref<392x32xf32, #tpu.memory_space<vmem>>, vector<32x32xf32>
    %cst_81 = arith.constant dense<0.000000e+00> : vector<32x32xf32>
    %164 = tpu.matmul %162, %163, %cst_81 {dimension_numbers = #tpu.dot_dimension_numbers<[1], [0], [0], [1], [0, 0, 1, 1], [], []>} : vector<32x32xf32>, vector<32x32xf32>, vector<32x32xf32> -> vector<32x32xf32>
    %c344 = arith.constant 344 : index
    %c0_82 = arith.constant 0 : index
    %165 = vector.load %arg0[%c344, %c0_82] : memref<392x32xf32, #tpu.memory_space<vmem>>, vector<1x32xf32>
    %166 = vector.broadcast %165 : vector<1x32xf32> to vector<32x32xf32>
    %167 = arith.addf %164, %166 : vector<32x32xf32>
    %cst_83 = arith.constant 0.000000e+00 : f32
    %168 = vector.broadcast %cst_83 : f32 to vector<32x32xf32>
    %169 = arith.cmpf ogt, %167, %168 : vector<32x32xf32>
    %cst_84 = arith.constant 0.00999999977 : f32
    %170 = vector.broadcast %cst_84 : f32 to vector<32x32xf32>
    %171 = arith.mulf %170, %167 : vector<32x32xf32>
    %172 = arith.select %169, %167, %171 : vector<32x32xi1>, vector<32x32xf32>
    %c352 = arith.constant 352 : index
    %c0_85 = arith.constant 0 : index
    %173 = vector.load %arg0[%c352, %c0_85] : memref<392x32xf32, #tpu.memory_space<vmem>>, vector<32x32xf32>
    %cst_86 = arith.constant dense<0.000000e+00> : vector<32x32xf32>
    %174 = tpu.matmul %172, %173, %cst_86 {dimension_numbers = #tpu.dot_dimension_numbers<[1], [0], [0], [1], [0, 0, 1, 1], [], []>} : vector<32x32xf32>, vector<32x32xf32>, vector<32x32xf32> -> vector<32x32xf32>
    %c384 = arith.constant 384 : index
    %c0_87 = arith.constant 0 : index
    %175 = vector.load %arg0[%c384, %c0_87] : memref<392x32xf32, #tpu.memory_space<vmem>>, vector<1x32xf32>
    %176 = vector.broadcast %175 : vector<1x32xf32> to vector<32x32xf32>
    %177 = arith.addf %174, %176 : vector<32x32xf32>
    %178 = tpu.iota {dimensions = array<i32: 1>} : vector<32x32xi32>
    %cst_88 = arith.constant 8.800000e+01 : f32
    %179 = vector.broadcast %cst_88 : f32 to vector<32x32xf32>
    %180 = arith.minimumf %177, %179 : vector<32x32xf32>
    %181 = math.exp %180 : vector<32x32xf32>
    %cst_89 = arith.constant 9.99999974E-5 : f32
    %182 = vector.broadcast %cst_89 : f32 to vector<32x32xf32>
    %183 = arith.addf %181, %182 : vector<32x32xf32>
    %184 = math.sqrt %183 : vector<32x32xf32>
    %c16_i32_90 = arith.constant 16 : i32
    %185 = vector.broadcast %c16_i32_90 : i32 to vector<32x32xi32>
    %186 = arith.cmpi sge, %178, %185 : vector<32x32xi32>
    %187 = arith.select %186, %184, %177 : vector<32x32xi1>, vector<32x32xf32>
    %c72 = arith.constant 72 : index
    %c0_91 = arith.constant 0 : index
    %188 = vector.load %arg1[%c72, %c0_91] : memref<88x32xf32, #tpu.memory_space<vmem>>, vector<16x16xf32>
    %189 = vector.extract_strided_slice %187 {offsets = [0, 0], sizes = [16, 16], strides = [1, 1]} : vector<32x32xf32> to vector<16x16xf32>
    %190 = vector.extract_strided_slice %187 {offsets = [0, 16], sizes = [16, 16], strides = [1, 1]} : vector<32x32xf32> to vector<16x16xf32>
    %191 = arith.mulf %190, %188 : vector<16x16xf32>
    %192 = arith.addf %189, %191 : vector<16x16xf32>
    %193 = vector.extract_strided_slice %187 {offsets = [0, 0], sizes = [16, 32], strides = [1, 1]} : vector<32x32xf32> to vector<16x32xf32>
    %c40 = arith.constant 40 : index
    %c0_92 = arith.constant 0 : index
    %194 = vector.load %arg3[%c40, %c0_92] : memref<56x128xf32, #tpu.memory_space<vmem>>, vector<16x32xf32>
    tpu.vector_store %arg3[%c40, %c0_92], %193 {strides = array<i32>} : memref<56x128xf32, #tpu.memory_space<vmem>>, vector<16x32xf32>,
    %c40_93 = arith.constant 40 : index
    %c32_94 = arith.constant 32 : index
    %195 = vector.load %arg3[%c40_93, %c32_94] : memref<56x128xf32, #tpu.memory_space<vmem>>, vector<16x16xf32>
    tpu.vector_store %arg3[%c40_93, %c32_94], %192 {strides = array<i32>} : memref<56x128xf32, #tpu.memory_space<vmem>>, vector<16x16xf32>,
    %196 = vector.extract_strided_slice %187 {offsets = [16, 0], sizes = [16, 32], strides = [1, 1]} : vector<32x32xf32> to vector<16x32xf32>
    %c40_95 = arith.constant 40 : index
    %c48_96 = arith.constant 48 : index
    %197 = vector.load %arg3[%c40_95, %c48_96] : memref<56x128xf32, #tpu.memory_space<vmem>>, vector<16x32xf32>
    tpu.vector_store %arg3[%c40_95, %c48_96], %196 {strides = array<i32>} : memref<56x128xf32, #tpu.memory_space<vmem>>, vector<16x32xf32>,
    return
  }
}

</mosaic_0001>

<bundles_post_ra>
// kernel: guide_forward.1
= control target key start
LH: loop header
LB: loop body
LE: loop exit
PB: predicated region body
PF: predicated region fallthrough
CT: control target
= control target key end

     0   :  { %vm54_vm5 = vcmask 130048   ;;  %v1043_v16 = vmov 1.0   ;;  %v1044_v20 = vmov 0.0   ;;  %vm118_vm12 = vcmask 261120   ;;  %s1045_s30 = smov 16   ;;  %s1046_s16 = smov 112   ;;  %s1536_s0 = inlined_call_operand.vmem [shape: f32[392,32], index: 0, kind: input, shape index: {}]   ;;  %s1537_s1 = inlined_call_operand.vmem [shape: f32[88,32], index: 1, kind: input, shape index: {}]   ;;  %s1538_s3 = inlined_call_operand.vmem [shape: f32[56,128], index: 3, kind: output, shape index: {}]   ;;  %s1539_s2 = inlined_call_operand.vmem [shape: f32[8,56], index: 2, kind: input, shape index: {}]  }
   0x1   :  { %v47_v0 = vld [vmem:[%s1536_s0 + $0x18] sm:$0xff]  ;;  %v46_v1 = vld [vmem:[%s1536_s0 + $0x10] sm:$0xff]  ;;  %v14_v2 = vld [vmem:[%s1536_s0] sm:$0xff]  ;;  %s1047_s19 = smov 96   ;;  %s1050_s24 = smov 32  }
   0x2   :  { %81 = vmatpush.msra.mxu0 %v47_v0  ;;  %vm16_vm0 = vcmp.ne.f32.partialorder %v14_v2, %v14_v2  ;;  %v18_v3 = vand.u32 2147483647, %v14_v2  ;;  %v15_v4 = vld [vmem:[%s1536_s0 + $0x8] sm:$0xff]  ;;  %v26_v5 = vld [vmem:[%s1537_s1] sm:$0xff]  ;;  %v381_v7 = vld [vmem:[%s1536_s0 + $0x90] sm:$0xff] }
   0x3   :  { %vm17_vm1 = vcmp.ne.f32.partialorder %v15_v4, %v15_v4  ;;  %v19_v6 = vand.u32 2147483647, %v15_v4  ;;  %v380_v8 = vld [vmem:[%s1536_s0 + $0x88] sm:$0xff]  ;;  %400 = vmatpush.msra.mxu3 %v381_v7  ;;  %v28_v10 = vld [vmem:[%s1537_s1 + $0x10] sm:$0xff]  ;;  %v29_v12 = vld [vmem:[%s1537_s1 + $0x18] sm:$0xff] }
   0x4   :  { %82 = vmatpush.msra.mxu0 %v46_v1  ;;  %vm20_vm2 = vcmp.eq.f32.partialorder %v18_v3, inf  ;;  %v27_v9 = vld [vmem:[%s1537_s1 + $0x8] sm:$0xff]  ;;  %v115_v11 = vld [vmem:[%s1536_s0 + $0x50] sm:$0xff]  ;;  %v113_v26 = vld [vmem:[%s1536_s0 + $0x40] sm:$0xff] }
   0x5   :  { %vm22_vm3 = vmor %vm16_vm0, %vm20_vm2  ;;  %vm21_vm4 = vcmp.eq.f32.partialorder %v19_v6, inf  ;;  %143 = vmatpush.msra.mxu1 %v115_v11  ;;  %401 = vmatpush.msra.mxu3 %v380_v8  ;;  %v114_v25 = vld [vmem:[%s1536_s0 + $0x48] sm:$0xff]  ;;  %v112_v27 = vld [vmem:[%s1536_s0 + $0x38] sm:$0xff] }
   0x6   :  { %v24_v13 = vsel %vm22_vm3, 0.0, %v14_v2  ;;  %vm23_vm6 = vmor %vm17_vm1, %vm21_vm4  ;;  %971 = vmatmul.msk.f32.vlgmr.msra.gmra.mxu3 %vm54_vm5, %v1043_v16  ;;  %v412_v28 = vld [vmem:[%s1536_s0 + $0xb8] sm:$0xff]  ;;  %v411_v29 = vld [vmem:[%s1536_s0 + $0xb0] sm:$0xff] }
   0x7   :  { %v30_v14 = vadd.f32 %v26_v5, %v24_v13  ;;  %v25_v15 = vsel %vm23_vm6, 0.0, %v15_v4  ;;  %v32_v17 = vadd.f32 %v28_v10, %v24_v13  ;;  %144 = vmatpush.msra.mxu1 %v114_v25  ;;  %429 = vmatpush.msrb.mxu3 %v412_v28  ;;  %v410_v30 = vld [vmem:[%s1536_s0 + $0xa8] sm:$0xff]  ;;  %v409_v31 = vld [vmem:[%s1536_s0 + $0xa0] sm:$0xff]  ;;  %v1001_v32 = vld [vmem:[%s1536_s0 + $0x30] ss:$0 sm:$0xff] }
   0x8   :  { %v31_v18 = vadd.f32 %v27_v9, %v25_v15  ;;  %v33_v19 = vadd.f32 %v29_v12, %v25_v15  ;;  %v48_v33 = vld [vmem:[%s1536_s0 + $0x20] sm:$0xff]  ;;  %v175_v35 = vld [vmem:[%s1536_s0 + $0x78] sm:$0xff]  ;;  %v49_v39 = vld [vmem:[%s1536_s0 + $0x28] sm:$0xff] }
   0x9   :  { %vm34_vm7 = vcmp.gt.f32.partialorder %v30_v14, 0.0  ;;  %vm36_vm8 = vcmp.gt.f32.partialorder %v32_v17, 0.0  ;;  %145 = vmatpush.msra.mxu1 %v113_v26  ;;  %430 = vmatpush.msrb.mxu3 %v411_v29  ;;  %v52_v34 = vadd.f32 %v1001_v32, %v48_v33  ;;  %v382_v37 = vld [vmem:[%s1536_s0 + $0x98] sm:$0x1]  ;;  %v53_v44 = vadd.f32 %v1001_v32, %v49_v39  ;;  %v174_v59 = vld [vmem:[%s1536_s0 + $0x70] sm:$0xff]  ;;  %v173_v60 = vld [vmem:[%s1536_s0 + $0x68] sm:$0xff] }
   0xa   :  { %v1106_v21 = vsel %vm34_vm7, 1.0, %v1044_v20  ;;  %vm35_vm9 = vcmp.gt.f32.partialorder %v31_v18, 0.0  ;;  %vm37_vm10 = vcmp.gt.f32.partialorder %v33_v19, 0.0  ;;  %v1122_v23 = vsel %vm36_vm8, 1.0, %v1044_v20  ;;  %202 = vmatpush.msra.mxu2 %v175_v35  ;;  %v172_v61 = vld [vmem:[%s1536_s0 + $0x60] sm:$0xff]  ;;  %v442_v63 = vld [vmem:[%s1536_s0 + $0xd8] sm:$0xff] }
   0xb   :  { %959 = vmatmul.msk.f32.vlgmr.msra.gmra.mxu0 %vm54_vm5, %v1106_v21  ;;  %334 = vst.msk [vmem:[%s1538_s3] sm:$0xff] %vm54_vm5, %v1106_v21  ;;  %v1115_v22 = vsel %vm35_vm9, 1.0, %v1044_v20  ;;  %v1129_v24 = vsel %vm37_vm10, 1.0, %v1044_v20  ;;  %146 = vmatpush.msra.mxu1 %v112_v27  ;;  %v443_v62 = vld [vmem:[%s1536_s0 + $0xe0] sm:$0xff]  ;;  %v441_v0 = vld [vmem:[%s1536_s0 + $0xd0] sm:$0xff]  ;;  %v440_v2 = vld [vmem:[%s1536_s0 + $0xc8] sm:$0xff] }
   0xc   :  { %335 = vst.msk [vmem:[%s1538_s3 + $0x8] sm:$0xff] %vm54_vm5, %v1115_v22  ;;  %431 = vmatpush.msrb.mxu3 %v410_v30  ;;  %203 = vmatpush.msra.mxu2 %v174_v59  ;;  %v1002_v1 = vld [vmem:[%s1536_s0 + $0x58] ss:$0 sm:$0xff]  ;;  %v291_v3 = vld [vmem:[%s1537_s1 + $0x28] sm:$0xff]  ;;  %v290_v8 = vld [vmem:[%s1537_s1 + $0x20] sm:$0xff] }
   0xd   :  { %336 = vst.msk [vmem:[%s1538_s3 + $0x10] sm:$0xff] %vm54_vm5, %v1122_v23  ;;  %300 = vrot.lane.b32.xlu0 %v291_v3, %s1045_s30  ;;  %v293_v4 = vld [vmem:[%s1537_s1 + $0x38] sm:$0xff]  ;;  %v292_v10 = vld [vmem:[%s1537_s1 + $0x30] sm:$0xff] }
   0xe   :  { %337 = vst.msk [vmem:[%s1538_s3 + $0x18] sm:$0xff] %vm54_vm5, %v1129_v24  ;;  %432 = vmatpush.msrb.mxu3 %v409_v31  ;;  %204 = vmatpush.msra.mxu2 %v173_v60  ;;  %v413_v11 = vld [vmem:[%s1536_s0 + $0xc0] sm:$0x1] }
   0xf   :  { %304 = vrot.lane.b32.xlu1 %v293_v4, %s1045_s30  ;;  %v1003_v32 = vld [vmem:[%s1536_s0 + $0x80] ss:$0 sm:$0xff] }
  0x10   :  { %205 = vmatpush.msra.mxu2 %v172_v61  ;;  %460 = vmatpush.msra.mxu3 %v443_v62 }
  0x12   :  { %461 = vmatpush.msra.mxu3 %v442_v63 }
  0x13   :  { %960 = vmatmul.msk.f32.gmra.mxu0 %vm54_vm5, %v1115_v22 }
  0x14   :  { %462 = vmatpush.msra.mxu3 %v441_v0 }
  0x15   :  { %298 = vrot.lane.b32.xlu0 %v290_v8, %s1045_s30 }
  0x16   :  { %463 = vmatpush.msra.mxu3 %v440_v2 }
  0x17   :  { %302 = vrot.lane.b32.xlu1 %v292_v10, %s1045_s30 }
  0x1b   :  { %961 = vmatmul.msk.f32.gmra.mxu0 %vm54_vm5, %v1122_v23 }
  0x23   :  { %962 = vmatmul.msk.f32.gmra.mxu0 %vm54_vm5, %v1129_v24 }
  0x7f   :  { %v301_v61 = vpop.permute.xlu0 %300 }
  0x88   :  { %v84_v36 = vpop.f32.mrf.mxu0 }
  0x89   :  { %v96_v38 = vadd.f32 %v84_v36, %v52_v34  ;;  %v403_v40 = vpop.f32.mrf.mxu3 }
  0x8a   :  { %v404_v42 = vadd.f32 %v403_v40, %v382_v37  ;;  %v444_v37 = vld [vmem:[%s1536_s0 + $0xe8] sm:$0x1] }
  0x8b   :  { %v104_v41 = vmul.f32 0.01, %v96_v38  ;;  %vm100_vm11 = vcmp.gt.f32.partialorder %v96_v38, 0.0 }
  0x8c   :  { %vm406_vm13 = vcmp.gt.f32.partialorder %v404_v42, 0.0  ;;  %v407_v45 = vmul.f32 0.01, %v404_v42 }
  0x8d   :  { %v108_v43 = vsel %vm100_vm11, %v96_v38, %v104_v41 }
  0x8e   :  { %963 = vmatmul.msk.f32.vlgmr.msra.gmra.mxu1 %vm118_vm12, %v108_v43  ;;  %v408_v46 = vsel %vm406_vm13, %v404_v42, %v407_v45 }
  0x8f   :  { %972 = vmatmul.msk.f32.vlgmr.msrb.gmra.mxu3 %vm118_vm12, %v408_v46 }
  0x90   :  { %v87_v47 = vpop.f32.mrf.mxu0 }
  0x91   :  { %v97_v48 = vadd.f32 %v87_v47, %v53_v44 }
  0x93   :  { %v105_v49 = vmul.f32 0.01, %v97_v48  ;;  %vm101_vm14 = vcmp.gt.f32.partialorder %v97_v48, 0.0 }
  0x95   :  { %v109_v50 = vsel %vm101_vm14, %v97_v48, %v105_v49 }
  0x96   :  { %964 = vmatmul.msk.f32.gmra.mxu1 %vm118_vm12, %v109_v50 }
  0x98   :  { %v90_v51 = vpop.f32.mrf.mxu0 }
  0x99   :  { %v98_v52 = vadd.f32 %v90_v51, %v52_v34 }
  0x9b   :  { %v106_v53 = vmul.f32 0.01, %v98_v52  ;;  %vm102_vm15 = vcmp.gt.f32.partialorder %v98_v52, 0.0 }
  0x9d   :  { %v110_v54 = vsel %vm102_vm15, %v98_v52, %v106_v53 }
  0x9e   :  { %965 = vmatmul.msk.f32.gmra.mxu1 %vm118_vm12, %v110_v54 }
  0xa0   :  { %v93_v55 = vpop.f32.mrf.mxu0 }
  0xa1   :  { %v99_v56 = vadd.f32 %v93_v55, %v53_v44 }
  0xa3   :  { %v107_v57 = vmul.f32 0.01, %v99_v56  ;;  %vm103_vm0 = vcmp.gt.f32.partialorder %v99_v56, 0.0 }
  0xa5   :  { %v111_v58 = vsel %vm103_vm0, %v99_v56, %v107_v57 }
  0xa6   :  { %966 = vmatmul.msk.f32.gmra.mxu1 %vm118_vm12, %v111_v58 }
 0x10b   :  { %v148_v5 = vpop.f32.mrf.mxu1 }
 0x10c   :  { %v149_v6 = vadd.f32 %v1002_v1, %v148_v5 }
 0x10e   :  { %v164_v7 = vmul.f32 0.01, %v149_v6  ;;  %vm160_vm1 = vcmp.gt.f32.partialorder %v149_v6, 0.0 }
 0x110   :  { %v168_v9 = vsel %vm160_vm1, %v149_v6, %v164_v7 }
 0x111   :  { %967 = vmatmul.msk.f32.vlgmr.msra.gmra.mxu2 %vm118_vm12, %v168_v9 }
 0x112   :  { %v434_v13 = vpop.f32.mrf.mxu3 }
 0x113   :  { %v151_v12 = vpop.f32.mrf.mxu1  ;;  %v435_v15 = vadd.f32 %v434_v13, %v413_v11 }
 0x114   :  { %v152_v14 = vadd.f32 %v1002_v1, %v151_v12 }
 0x115   :  { %vm437_vm3 = vcmp.gt.f32.partialorder %v435_v15, 0.0  ;;  %v438_v17 = vmul.f32 0.01, %v435_v15 }
 0x116   :  { %v165_v16 = vmul.f32 0.01, %v152_v14  ;;  %vm161_vm2 = vcmp.gt.f32.partialorder %v152_v14, 0.0 }
 0x117   :  { %v439_v19 = vsel %vm437_vm3, %v435_v15, %v438_v17  ;;  %vm628_vm3 = vcmask 64512  }
 0x118   :  { %v169_v18 = vsel %vm161_vm2, %v152_v14, %v165_v16  ;;  %973 = vmatmul.msk.f32.vlgmr.msra.gmra.mxu3 %vm118_vm12, %v439_v19 }
 0x119   :  { %968 = vmatmul.msk.f32.gmra.mxu2 %vm118_vm12, %v169_v18 }
 0x11b   :  { %v154_v20 = vpop.f32.mrf.mxu1 }
 0x11c   :  { %v155_v25 = vadd.f32 %v1002_v1, %v154_v20  ;;  %v299_v20 = vpop.permute.xlu0 %298 }
 0x11e   :  { %v166_v26 = vmul.f32 0.01, %v155_v25  ;;  %vm162_vm4 = vcmp.gt.f32.partialorder %v155_v25, 0.0 }
 0x120   :  { %v170_v27 = vsel %vm162_vm4, %v155_v25, %v166_v26  ;;  %vm354_vm4 = vcmask 392320  }
 0x121   :  { %969 = vmatmul.msk.f32.gmra.mxu2 %vm118_vm12, %v170_v27 }
 0x123   :  { %v157_v28 = vpop.f32.mrf.mxu1 }
 0x124   :  { %v158_v29 = vadd.f32 %v1002_v1, %v157_v28  ;;  %v219_v1 = vlaneseq }
 0x126   :  { %v167_v30 = vmul.f32 0.01, %v158_v29  ;;  %vm163_vm6 = vcmp.gt.f32.partialorder %v158_v29, 0.0  ;;  %v1259_v9 = vand.u32 127, %v219_v1  ;;  %v507_v1 = vld [vmem:[%s1539_s2] sm:$0xff]  ;;  %s1048_s2 = smov 80  }
 0x128   :  { %v171_v31 = vsel %vm163_vm6, %v158_v29, %v167_v30  ;;  %vm285_vm7 = vcmp.ge.s32.totalorder %v1259_v9, 16 }
 0x129   :  { %970 = vmatmul.msk.f32.gmra.mxu2 %vm118_vm12, %v171_v31 }
 0x194   :  { %v207_v33 = vpop.f32.mrf.mxu2 }
 0x195   :  { %v1234_v34 = vadd.f32 %v1003_v32, %v207_v33 }
 0x197   :  { %v221_v35 = vmin.f32 %v1234_v34, 88.0 }
 0x199   :  { %v225_v36 = vmul.f32 1.442695, %v221_v35  ;;  %v305_v35 = vpop.permute.xlu1 %304 }
 0x19b   :  { %1007 = vpow2.f32 %v225_v36  ;;  %v465_v39 = vpop.f32.mrf.mxu3 }
 0x19c   :  { %v210_v38 = vpop.f32.mrf.mxu2  ;;  %v1242_v41 = vadd.f32 %v465_v39, %v444_v37 }
 0x19d   :  { %v1240_v40 = vadd.f32 %v1003_v32, %v210_v38 }
 0x19e   :  { %v468_v43 = vmin.f32 %v1242_v41, 88.0 }
 0x19f   :  { %v222_v42 = vmin.f32 %v1240_v40, 88.0 }
 0x1a0   :  { %v469_v46 = vmul.f32 1.442695, %v468_v43 }
 0x1a1   :  { %v1008_v44 = vpop.eup %1007  ;;  %v227_v45 = vmul.f32 1.442695, %v222_v42 }
 0x1a2   :  { %v233_v47 = vadd.f32 0.0001, %v1008_v44 }
 0x1a3   :  { %1009 = vpow2.f32 %v227_v45 }
 0x1a4   :  { %v213_v48 = vpop.f32.mrf.mxu2  ;;  %1011 = vpow2.f32 %v469_v46  ;;  %vm244_vm8 = vcmp.eq.f32.partialorder %v233_v47, inf  ;;  %v247_v17 = vand.u32 2147483648, %v233_v47  ;;  %vm246_vm9 = vcmp.eq.f32.partialorder %v233_v47, 0.0 }
 0x1a5   :  { %v1246_v49 = vadd.f32 %v1003_v32, %v213_v48  ;;  %1013 = vrsqrt.f32 %v233_v47 }
 0x1a7   :  { %v223_v50 = vmin.f32 %v1246_v49, 88.0 }
 0x1a9   :  { %v1010_v51 = vpop.eup %1009  ;;  %v229_v52 = vmul.f32 1.442695, %v223_v50 }
 0x1aa   :  { %v1012_v53 = vpop.eup %1011  ;;  %v234_v54 = vadd.f32 0.0001, %v1010_v51 }
 0x1ab   :  { %v1014_v55 = vpop.eup %1013  ;;  %1015 = vpow2.f32 %v229_v52  ;;  %v1249_v56 = vadd.f32 0.0001, %v1012_v53 }
 0x1ac   :  { %v216_v57 = vpop.f32.mrf.mxu2  ;;  %1017 = vrsqrt.f32 %v234_v54  ;;  %v238_v59 = vmul.f32 %v1014_v55, %v233_v47  ;;  %vm256_vm10 = vcmp.eq.f32.partialorder %v234_v54, inf  ;;  %v259_v33 = vand.u32 2147483648, %v234_v54 }
 0x1ad   :  { %v1251_v58 = vadd.f32 %v1003_v32, %v216_v57  ;;  %1019 = vrsqrt.f32 %v1249_v56  ;;  %vm258_vm11 = vcmp.eq.f32.partialorder %v234_v54, 0.0  ;;  %vm479_vm15 = vcmp.eq.f32.partialorder %v1249_v56, inf }
 0x1ae   :  { %v239_v62 = vmul.f32 %v1014_v55, %v238_v59  ;;  %vm481_vm0 = vcmp.eq.f32.partialorder %v1249_v56, 0.0 }
 0x1af   :  { %v224_v60 = vmin.f32 %v1251_v58, 88.0 }
 0x1b0   :  { %v240_v4 = vmul.f32 0.5, %v239_v62 }
 0x1b1   :  { %v1016_v63 = vpop.eup %1015  ;;  %v231_v0 = vmul.f32 1.442695, %v224_v60 }
 0x1b2   :  { %v1018_v2 = vpop.eup %1017  ;;  %v1255_v3 = vadd.f32 0.0001, %v1016_v63  ;;  %v241_v8 = vsub.f32 1.5, %v240_v4 }
 0x1b3   :  { %v1020_v5 = vpop.eup %1019  ;;  %1021 = vpow2.f32 %v231_v0  ;;  %v250_v6 = vmul.f32 %v1018_v2, %v234_v54 }
 0x1b4   :  { %v473_v7 = vmul.f32 %v1020_v5, %v1249_v56  ;;  %1023 = vrsqrt.f32 %v1255_v3  ;;  %v242_v11 = vmul.f32 %v1014_v55, %v241_v8  ;;  %vm268_vm13 = vcmp.eq.f32.partialorder %v1255_v3, inf }
 0x1b5   :  { %v251_v10 = vmul.f32 %v1018_v2, %v250_v6  ;;  %v271_v53 = vand.u32 2147483648, %v1255_v3  ;;  %vm270_vm14 = vcmp.eq.f32.partialorder %v1255_v3, 0.0 }
 0x1b6   :  { %v474_v13 = vmul.f32 %v1020_v5, %v473_v7  ;;  %v243_v14 = vmul.f32 %v242_v11, %v233_v47 }
 0x1b7   :  { %v252_v12 = vmul.f32 0.5, %v251_v10  ;;  %v511_v10 = vld [vmem:[%s1536_s0 + $0x108] sm:$0xff] }
 0x1b8   :  { %v245_v25 = vsel %vm244_vm8, %v233_v47, %v243_v14  ;;  %v475_v29 = vmul.f32 0.5, %v474_v13  ;;  %533 = vmatpush.msrb.mxu3 %v511_v10  ;;  %v509_v13 = vld [vmem:[%s1536_s0 + $0xf8] sm:$0xff]  ;;  %vm375_vm8 = vcmask 523648  }
 0x1b9   :  { %v1022_v15 = vpop.eup %1021  ;;  %v253_v16 = vsub.f32 1.5, %v252_v12  ;;  %v248_v27 = vsel %vm246_vm9, %v247_v17, %v245_v25  ;;  %v510_v12 = vld [vmem:[%s1536_s0 + $0x100] sm:$0xff] }
 0x1ba   :  { %v1024_v18 = vpop.eup %1023  ;;  %v236_v19 = vadd.f32 0.0001, %v1022_v15  ;;  %v1266_v30 = vsel %vm285_vm7, %v248_v27, %v1234_v34  ;;  %v476_v38 = vsub.f32 1.5, %v475_v29  ;;  %534 = vmatpush.msrb.mxu3 %v510_v12  ;;  %v508_v15 = vld [vmem:[%s1536_s0 + $0xf0] sm:$0xff] }
 0x1bb   :  { %v254_v26 = vmul.f32 %v1018_v2, %v253_v16  ;;  %v262_v28 = vmul.f32 %v1024_v18, %v1255_v3  ;;  %v310_v32 = vmul.f32 %v299_v20, %v1266_v30 }
 0x1bc   :  { %1025 = vrsqrt.f32 %v236_v19  ;;  %v477_v47 = vmul.f32 %v1020_v5, %v476_v38  ;;  %vm280_vm1 = vcmp.eq.f32.partialorder %v236_v19, inf  ;;  %vm282_vm2 = vcmp.eq.f32.partialorder %v236_v19, 0.0  ;;  %535 = vmatpush.msrb.mxu3 %v509_v13 }
 0x1bd   :  { %v255_v31 = vmul.f32 %v254_v26, %v234_v54  ;;  %v263_v36 = vmul.f32 %v1024_v18, %v262_v28  ;;  %318 = vrot.lane.b32.xlu2 %v310_v32, %s1046_s16 }
 0x1be   :  { %536 = vmatpush.msrb.mxu3 %v508_v15  ;;  %v792_v15 = vld [vmem:[%s1536_s0 + $0x170] sm:$0xff] }
 0x1bf   :  { %v257_v37 = vsel %vm256_vm10, %v234_v54, %v255_v31  ;;  %v264_v42 = vmul.f32 0.5, %v263_v36  ;;  %v303_v54 = vpop.permute.xlu1 %302  ;;  %974 = vmatmul.msk.f32.vlgmr.msrb.gmra.mxu3 %vm118_vm12, %v507_v1 }
 0x1c0   :  { %v260_v39 = vsel %vm258_vm11, %v259_v33, %v257_v37  ;;  %v485_v33 = vld [vmem:[%s1537_s1 + $0x40] sm:$0xff] }
 0x1c1   :  { %v1273_v34 = vsel %vm285_vm7, %v260_v39, %v1240_v40  ;;  %v265_v44 = vsub.f32 1.5, %v264_v42  ;;  %v478_v40 = vmul.f32 %v477_v47, %v1249_v56  ;;  %v1004_v47 = vld [vmem:[%s1536_s0 + $0x130] ss:$0 sm:$0xff] }
 0x1c2   :  { %v1026_v43 = vpop.eup %1025  ;;  %v311_v45 = vmul.f32 %v301_v61, %v1273_v34  ;;  %v482_v61 = vand.u32 2147483648, %v1249_v56 }
 0x1c3   :  { %v274_v46 = vmul.f32 %v1026_v43, %v236_v19  ;;  %v266_v48 = vmul.f32 %v1024_v18, %v265_v44  ;;  %v480_v0 = vsel %vm479_vm15, %v1249_v56, %v478_v40  ;;  %v512_v18 = vld [vmem:[%s1536_s0 + $0x110] sm:$0xff] }
 0x1c5   :  { %v275_v50 = vmul.f32 %v1026_v43, %v274_v46  ;;  %v267_v51 = vmul.f32 %v266_v48, %v1255_v3  ;;  %320 = vrot.lane.b32.xlu2 %v311_v45, %s1046_s16 }
 0x1c7   :  { %v276_v52 = vmul.f32 0.5, %v275_v50  ;;  %v269_v55 = vsel %vm268_vm13, %v1255_v3, %v267_v51  ;;  %v283_v3 = vand.u32 2147483648, %v236_v19 }
 0x1c8   :  { %v272_v59 = vsel %vm270_vm14, %v271_v53, %v269_v55  ;;  %v514_v53 = vld [vmem:[%s1536_s0 + $0x120] sm:$0xff] }
 0x1c9   :  { %v277_v57 = vsub.f32 1.5, %v276_v52  ;;  %v1287_v60 = vsel %vm285_vm7, %v272_v59, %v1246_v49  ;;  %v483_v49 = vsel %vm481_vm0, %v482_v61, %v480_v0  ;;  %v515_v52 = vld [vmem:[%s1536_s0 + $0x128] sm:$0xff]  ;;  %v732_v0 = vld [vmem:[%s1536_s0 + $0x140] sm:$0xff] }
 0x1ca   :  { %v312_v63 = vmul.f32 %v303_v54, %v1287_v60  ;;  %v1305_v56 = vsel %vm285_vm7, %v483_v49, %v1242_v41 }
 0x1cb   :  { %v278_v62 = vmul.f32 %v1026_v43, %v277_v57  ;;  %v906_v57 = vld [vmem:[%s1537_s1 + $0x50] sm:$0xff] }
 0x1cc   :  { %322 = vrot.lane.b32.xlu1 %v312_v63, %s1046_s16  ;;  %v734_v63 = vld [vmem:[%s1536_s0 + $0x150] sm:$0xff] }
 0x1cd   :  { %v279_v2 = vmul.f32 %v278_v62, %v236_v19  ;;  %545 = vrot.lane.b32.xlu2 %v507_v1, %s1047_s19  ;;  %s1049_s19 = smov 48  }
 0x1cf   :  { %v281_v4 = vsel %vm280_vm1, %v236_v19, %v279_v2  ;;  %v622_v19 = vsub.f32 1.0, %v507_v1 }
 0x1d0   :  { %v284_v5 = vsel %vm282_vm2, %v283_v3, %v281_v4 }
 0x1d1   :  { %v1300_v6 = vsel %vm285_vm7, %v284_v5, %v1251_v58 }
 0x1d2   :  { %v313_v7 = vmul.f32 %v305_v35, %v1300_v6 }
 0x1d4   :  { %324 = vrot.lane.b32.xlu0 %v313_v7, %s1046_s16  ;;  %487 = vrot.lane.b32.xlu1 %v1305_v56, %s1045_s30 }
 0x1d5   :  { %624 = vrot.lane.b32.xlu2 %v507_v1, %s1048_s2  ;;  %v731_v1 = vld [vmem:[%s1536_s0 + $0x138] sm:$0xff] }
 0x1dc   :  { %491 = vrot.lane.b32.xlu0 %v1305_v56, %s1046_s16 }
 0x1e4   :  { %626 = vrot.lane.b32.xlu0 %v622_v19, %s1048_s2 }
 0x217   :  { %v319_v8 = vpop.permute.xlu2 %318 }
 0x218   :  { %v1317_v41 = vadd.f32 %v319_v8, %v1266_v30 }
 0x21a   :  { %v541_v16 = vmul.f32 %v1106_v21, %v1317_v41 }
 0x21f   :  { %v321_v58 = vpop.permute.xlu2 %320 }
 0x220   :  { %v1320_v11 = vadd.f32 %v321_v58, %v1273_v34 }
 0x222   :  { %v542_v14 = vmul.f32 %v1115_v22, %v1320_v11  ;;  %v513_v22 = vld [vmem:[%s1536_s0 + $0x118] sm:$0xff] }
 0x223   :  { %613 = vmatpush.msrb.mxu2 %v513_v22  ;;  %v905_v22 = vld [vmem:[%s1537_s1 + $0x48] sm:$0xff] }
 0x224   :  { %563 = vmatpush.msrb.mxu0 %v542_v14  ;;  %v793_v14 = vld [vmem:[%s1536_s0 + $0x178] sm:$0xff]  ;;  %909 = vrot.lane.b32.xlu0 %v905_v22, %s1045_s30 }
 0x225   :  { %614 = vmatpush.msrb.mxu2 %v512_v18  ;;  %820 = vmatpush.msrb.mxu1 %v793_v14 }
 0x226   :  { %564 = vmatpush.msrb.mxu0 %v541_v16  ;;  %v791_v16 = vld [vmem:[%s1536_s0 + $0x168] sm:$0xff] }
 0x227   :  { %v546_v17 = vpop.permute.xlu2 %545  ;;  %821 = vmatpush.msrb.mxu1 %v792_v15 }
 0x228   :  { %975 = vmatmul.msk.f32.vlgmr.msrb.gmra.mxu0 %vm54_vm5, %v546_v17 }
 0x229   :  { %698 = vmatpush.msra.mxu0 %v515_v52  ;;  %822 = vmatpush.msrb.mxu1 %v791_v16 }
 0x22b   :  { %699 = vmatpush.msra.mxu0 %v514_v53 }
 0x22f   :  { %v625_v45 = vpop.permute.xlu2 %624 }
 0x23e   :  { %v323_v21 = vpop.permute.xlu1 %322 }
 0x23f   :  { %v1344_v25 = vadd.f32 %v323_v21, %v1287_v60 }
 0x241   :  { %v543_v28 = vmul.f32 %v1122_v23, %v1344_v25 }
 0x242   :  { %v538_v42 = vpop.f32.mrf.mxu3 }
 0x243   :  { %v539_v48 = vadd.f32 %v1004_v47, %v538_v42 }
 0x246   :  { %v325_v20 = vpop.permute.xlu0 %324  ;;  %v488_v29 = vpop.permute.xlu1 %487 }
 0x247   :  { %v333_v26 = vadd.f32 %v325_v20, %v1300_v6  ;;  %v490_v32 = vsel %vm54_vm5, %v1305_v56, %v488_v29 }
 0x248   :  { %v497_v36 = vperm.slane %v490_v32, 0 }
 0x249   :  { %v544_v27 = vmul.f32 %v1129_v24, %v333_v26 }
 0x24b   :  { %584 = vmatpush.msra.mxu3 %v544_v27 }
 0x24d   :  { %585 = vmatpush.msra.mxu3 %v543_v28 }
 0x24e   :  { %976 = vmatmul.msk.f32.vlgmr.msra.gmra.mxu3 %vm54_vm5, %v546_v17  ;;  %v492_v31 = vpop.permute.xlu0 %491  ;;  %v790_v17 = vld [vmem:[%s1536_s0 + $0x160] sm:$0xff] }
 0x24f   :  { %v494_v35 = vsel %vm54_vm5, %v492_v31, %v1305_v56  ;;  %761 = vmatpush.msrb.mxu3 %v734_v63  ;;  %823 = vmatpush.msrb.mxu1 %v790_v17 }
 0x250   :  { %v495_v24 = vperm.slane %v494_v35, 0  ;;  %v1005_v35 = vld [vmem:[%s1536_s0 + $0x158] ss:$0 sm:$0xff] }
 0x252   :  { %v496_v37 = vmul.f32 %v495_v24, %v485_v33 }
 0x254   :  { %v498_v23 = vadd.f32 %v497_v36, %v496_v37 }
 0x256   :  { %499 = vst.msk [vmem:[%s1538_s3 + $0x20] sm:$0xff] %vm118_vm12, %v498_v23  ;;  %648 = vmatpush.msra.mxu2 %v498_v23  ;;  %v627_v46 = vpop.permute.xlu0 %626 }
 0x2a5   :  { %v566_v38 = vpop.f32.mrf.mxu0 }
 0x2a6   :  { %569 = vst.msk [vmem:[#allocation2] sm:$0xff] %vm54_vm5, %v566_v38 }
 0x2ad   :  { %v591_v39 = vld [vmem:[#allocation2] sm:$0xff] }
 0x2ae   :  { %977 = vmatmul.msk.f32.vlgmr.msrb.gmra.mxu2 %vm54_vm5, %v591_v39 }
 0x2d1   :  { %v587_v43 = vpop.f32.mrf.mxu3 }
 0x2d2   :  { %590 = vst.msk [vmem:[#allocation2 + $0x8] sm:$0xff] %vm54_vm5, %v587_v43 }
 0x2d9   :  { %v592_v44 = vld [vmem:[#allocation2 + $0x8] sm:$0xff] }
 0x2da   :  { %978 = vmatmul.msk.f32.gmra.mxu2 %vm54_vm5, %v592_v44 }
 0x2e2   :  { %979 = vmatmul.msk.f32.vlgmr.msra.gmra.mxu2 %vm628_vm3, %v625_v45 }
 0x2ea   :  { %980 = vmatmul.msk.f32.gmra.mxu2 %vm628_vm3, %v627_v46 }
 0x331   :  { %v616_v50 = vpop.f32.mrf.mxu2 }
 0x332   :  { %v1369_v51 = vadd.f32 %v616_v50, %v539_v48  ;;  %v1462_v50 = vld [vmem:[%s1536_s0 + $0x180] ss:$0 sm:$0xff] }
 0x35d   :  { %v619_v40 = vpop.f32.mrf.mxu2 }
 0x35e   :  { %v1377_v54 = vadd.f32 %v619_v40, %v539_v48 }
 0x365   :  { %v650_v55 = vpop.f32.mrf.mxu2 }
 0x366   :  { %656 = vst.msk [vmem:[#allocation3] sm:$0xff] %vm54_vm5, %v650_v55  ;;  %659 = vrot.lane.b32.xlu1 %v650_v55, %s1046_s16 }
 0x36d   :  { %v668_v59 = vld [vmem:[#allocation3] sm:$0xff]  ;;  %v653_v61 = vpop.f32.mrf.mxu2 }
 0x36e   :  { %911 = vrot.lane.b32.xlu1 %v906_v57, %s1045_s30  ;;  %981 = vmatmul.msk.f32.vlgmr.msra.gmra.mxu0 %vm54_vm5, %v668_v59  ;;  %657 = vst.msk [vmem:[#allocation3 + $0x10] sm:$0xff] %vm54_vm5, %v653_v61 }
 0x36f   :  { %664 = vrot.lane.b32.xlu2 %v653_v61, %s1046_s16 }
 0x375   :  { %v670_v4 = vld [vmem:[#allocation3 + $0x10] sm:$0xff] }
 0x376   :  { %342 = vrot.lane.b32.xlu1 %v1266_v30, %s1045_s30  ;;  %v733_v30 = vld [vmem:[%s1536_s0 + $0x148] sm:$0xff] }
 0x377   :  { %762 = vmatpush.msrb.mxu3 %v733_v30 }
 0x379   :  { %763 = vmatpush.msrb.mxu3 %v732_v0 }
 0x37b   :  { %764 = vmatpush.msrb.mxu3 %v731_v1 }
 0x37e   :  { %348 = vrot.lane.b32.xlu1 %v1300_v6, %s1045_s30 }
 0x386   :  { %363 = vrot.lane.b32.xlu1 %v1317_v41, %s1049_s19 }
 0x38e   :  { %369 = vrot.lane.b32.xlu1 %v333_v26, %s1049_s19 }
 0x3c9   :  { %v665_v62 = vpop.permute.xlu2 %664 }
 0x3ca   :  { %667 = vst.msk [vmem:[#allocation3 + $0x18] sm:$0xff] %vm54_vm5, %v665_v62 }
 0x3d1   :  { %v671_v58 = vld [vmem:[#allocation3 + $0x18] sm:$0xff] }
 0x3d8   :  { %v660_v2 = vpop.permute.xlu1 %659 }
 0x3d9   :  { %662 = vst.msk [vmem:[#allocation3 + $0x8] sm:$0xff] %vm54_vm5, %v660_v2 }
 0x3e0   :  { %v1409_v3 = vpop.permute.xlu1 %911  ;;  %v669_v49 = vld [vmem:[#allocation3 + $0x8] sm:$0xff] }
 0x3e1   :  { %982 = vmatmul.msk.f32.gmra.mxu0 %vm54_vm5, %v669_v49 }
 0x3e8   :  { %v343_v5 = vpop.permute.xlu1 %342 }
 0x3e9   :  { %355 = vst.msk [vmem:[%s1538_s3] sm:$0xff] %vm354_vm4, %v343_v5  ;;  %983 = vmatmul.msk.f32.gmra.mxu0 %vm54_vm5, %v670_v4 }
 0x3eb   :  { %v701_v6 = vpop.f32.mrf.mxu0 }
 0x3ec   :  { %v715_v7 = vadd.f32 %v1369_v51, %v701_v6 }
 0x3ee   :  { %vm719_vm6 = vcmp.gt.f32.partialorder %v715_v7, 0.0  ;;  %v723_v8 = vmul.f32 0.01, %v715_v7 }
 0x3f0   :  { %v727_v10 = vsel %vm719_vm6, %v715_v7, %v723_v8  ;;  %v349_v41 = vpop.permute.xlu1 %348  ;;  %v910_v7 = vpop.permute.xlu0 %909 }
 0x3f1   :  { %358 = vst.msk [vmem:[%s1538_s3 + $0x18] sm:$0xff] %vm354_vm4, %v349_v41  ;;  %984 = vmatmul.msk.f32.gmra.mxu0 %vm54_vm5, %v671_v58  ;;  %985 = vmatmul.msk.f32.vlgmr.msrb.gmra.mxu3 %vm118_vm12, %v727_v10 }
 0x3f8   :  { %v364_v12 = vpop.permute.xlu1 %363 }
 0x3f9   :  { %376 = vst.msk [vmem:[%s1538_s3] sm:$0xff] %vm375_vm8, %v364_v12 }
 0x400   :  { %v370_v13 = vpop.permute.xlu1 %369 }
 0x401   :  { %379 = vst.msk [vmem:[%s1538_s3 + $0x18] sm:$0xff] %vm375_vm8, %v370_v13 }
 0x45e   :  { %v704_v18 = vpop.f32.mrf.mxu0 }
 0x45f   :  { %v716_v19 = vadd.f32 %v1377_v54, %v704_v18 }
 0x461   :  { %v724_v21 = vmul.f32 0.01, %v716_v19  ;;  %vm720_vm5 = vcmp.gt.f32.partialorder %v716_v19, 0.0 }
 0x463   :  { %v728_v20 = vsel %vm720_vm5, %v716_v19, %v724_v21 }
 0x464   :  { %986 = vmatmul.msk.f32.gmra.mxu3 %vm118_vm12, %v728_v20 }
 0x466   :  { %v707_v26 = vpop.f32.mrf.mxu0 }
 0x467   :  { %v717_v27 = vadd.f32 %v1369_v51, %v707_v26 }
 0x469   :  { %v725_v28 = vmul.f32 0.01, %v717_v27  ;;  %vm721_vm9 = vcmp.gt.f32.partialorder %v717_v27, 0.0 }
 0x46b   :  { %v729_v29 = vsel %vm721_vm9, %v717_v27, %v725_v28  ;;  %vm505_vm9 = vcmask 523520  }
 0x46c   :  { %987 = vmatmul.msk.f32.gmra.mxu3 %vm118_vm12, %v729_v29  ;;  %v500_v29 = vperm.slane %v1305_v56, 0 }
 0x46e   :  { %v710_v31 = vpop.f32.mrf.mxu0 }
 0x46f   :  { %v718_v32 = vadd.f32 %v1377_v54, %v710_v31 }
 0x471   :  { %v726_v33 = vmul.f32 0.01, %v718_v32  ;;  %vm722_vm10 = vcmp.gt.f32.partialorder %v718_v32, 0.0 }
 0x473   :  { %v730_v24 = vsel %vm722_vm10, %v718_v32, %v726_v33 }
 0x474   :  { %v766_v36 = vpop.f32.mrf.mxu3  ;;  %988 = vmatmul.msk.f32.gmra.mxu3 %vm118_vm12, %v730_v24 }
 0x475   :  { %v767_v37 = vadd.f32 %v1005_v35, %v766_v36 }
 0x477   :  { %vm778_vm11 = vcmp.gt.f32.partialorder %v767_v37, 0.0  ;;  %v782_v23 = vmul.f32 0.01, %v767_v37 }
 0x479   :  { %v786_v38 = vsel %vm778_vm11, %v767_v37, %v782_v23 }
 0x47a   :  { %989 = vmatmul.msk.f32.vlgmr.msrb.gmra.mxu1 %vm118_vm12, %v786_v38 }
 0x4e7   :  { %v769_v39 = vpop.f32.mrf.mxu3 }
 0x4e8   :  { %v770_v42 = vadd.f32 %v1005_v35, %v769_v39 }
 0x4ea   :  { %v783_v43 = vmul.f32 0.01, %v770_v42  ;;  %vm779_vm13 = vcmp.gt.f32.partialorder %v770_v42, 0.0 }
 0x4ec   :  { %v787_v44 = vsel %vm779_vm13, %v770_v42, %v783_v43  ;;  %vm948_vm13 = vcmask 654720  }
 0x4ed   :  { %990 = vmatmul.msk.f32.gmra.mxu1 %vm118_vm12, %v787_v44 }
 0x4ef   :  { %v772_v45 = vpop.f32.mrf.mxu3 }
 0x4f0   :  { %v773_v46 = vadd.f32 %v1005_v35, %v772_v45 }
 0x4f2   :  { %v784_v47 = vmul.f32 0.01, %v773_v46  ;;  %vm780_vm14 = vcmp.gt.f32.partialorder %v773_v46, 0.0 }
 0x4f4   :  { %v788_v48 = vsel %vm780_vm14, %v773_v46, %v784_v47 }
 0x4f5   :  { %991 = vmatmul.msk.f32.gmra.mxu1 %vm118_vm12, %v788_v48 }
 0x4f7   :  { %v775_v51 = vpop.f32.mrf.mxu3  ;;  %v825_v52 = vpop.f32.mrf.mxu1 }
 0x4f8   :  { %v776_v53 = vadd.f32 %v1005_v35, %v775_v51  ;;  %v826_v40 = vadd.f32 %v1462_v50, %v825_v52 }
 0x4fa   :  { %v785_v54 = vmul.f32 0.01, %v776_v53  ;;  %v837_v55 = vmin.f32 %v826_v40, 88.0  ;;  %vm781_vm15 = vcmp.gt.f32.partialorder %v776_v53, 0.0 }
 0x4fc   :  { %v841_v57 = vmul.f32 1.442695, %v837_v55  ;;  %v789_v59 = vsel %vm781_vm15, %v776_v53, %v785_v54 }
 0x4fd   :  { %992 = vmatmul.msk.f32.gmra.mxu1 %vm118_vm12, %v789_v59 }
 0x4fe   :  { %1027 = vpow2.f32 %v841_v57 }
 0x504   :  { %v1028_v61 = vpop.eup %1027 }
 0x505   :  { %v849_v62 = vadd.f32 0.0001, %v1028_v61 }
 0x507   :  { %1029 = vrsqrt.f32 %v849_v62  ;;  %vm860_vm0 = vcmp.eq.f32.partialorder %v849_v62, inf  ;;  %v863_v5 = vand.u32 2147483648, %v849_v62  ;;  %vm862_vm1 = vcmp.eq.f32.partialorder %v849_v62, 0.0 }
 0x50d   :  { %v1030_v63 = vpop.eup %1029 }
 0x50e   :  { %v854_v30 = vmul.f32 %v1030_v63, %v849_v62 }
 0x510   :  { %v855_v0 = vmul.f32 %v1030_v63, %v854_v30 }
 0x512   :  { %v856_v1 = vmul.f32 0.5, %v855_v0 }
 0x514   :  { %v857_v2 = vsub.f32 1.5, %v856_v1 }
 0x516   :  { %v858_v49 = vmul.f32 %v1030_v63, %v857_v2 }
 0x518   :  { %v859_v4 = vmul.f32 %v858_v49, %v849_v62 }
 0x51a   :  { %v861_v6 = vsel %vm860_vm0, %v849_v62, %v859_v4 }
 0x51b   :  { %v864_v8 = vsel %vm862_vm1, %v863_v5, %v861_v6 }
 0x51c   :  { %v901_v58 = vsel %vm285_vm7, %v864_v8, %v826_v40 }
 0x51d   :  { %927 = vst.msk [vmem:[%s1538_s3 + $0x28] sm:$0xff] %vm118_vm12, %v901_v58  ;;  %v915_v10 = vmul.f32 %v910_v7, %v901_v58 }
 0x51f   :  { %919 = vrot.lane.b32.xlu2 %v915_v10, %s1046_s16 }
 0x527   :  { %344 = vrot.lane.b32.xlu2 %v1273_v34, %s1045_s30 }
 0x52f   :  { %365 = vrot.lane.b32.xlu2 %v1320_v11, %s1049_s19 }
 0x56a   :  { %v828_v41 = vpop.f32.mrf.mxu1 }
 0x56b   :  { %v829_v12 = vadd.f32 %v1462_v50, %v828_v41 }
 0x56d   :  { %v838_v13 = vmin.f32 %v829_v12, 88.0 }
 0x56f   :  { %v843_v14 = vmul.f32 1.442695, %v838_v13 }
 0x571   :  { %1031 = vpow2.f32 %v843_v14 }
 0x572   :  { %v831_v15 = vpop.f32.mrf.mxu1 }
 0x577   :  { %v1032_v16 = vpop.eup %1031 }
 0x578   :  { %v850_v17 = vadd.f32 0.0001, %v1032_v16 }
 0x579   :  { %v920_v22 = vpop.permute.xlu2 %919 }
 0x57a   :  { %1033 = vrsqrt.f32 %v850_v17  ;;  %v834_v18 = vpop.f32.mrf.mxu1  ;;  %v925_v19 = vadd.f32 %v920_v22, %v901_v58  ;;  %vm872_vm2 = vcmp.eq.f32.partialorder %v850_v17, inf  ;;  %v875_v23 = vand.u32 2147483648, %v850_v17 }
 0x57b   :  { %v835_v21 = vadd.f32 %v1462_v50, %v834_v18  ;;  %vm874_vm3 = vcmp.eq.f32.partialorder %v850_v17, 0.0 }
 0x57c   :  { %931 = vrot.lane.b32.xlu2 %v925_v19, %s1050_s24 }
 0x57d   :  { %v840_v20 = vmin.f32 %v835_v21, 88.0 }
 0x57f   :  { %v847_v34 = vmul.f32 1.442695, %v840_v20 }
 0x580   :  { %v1034_v11 = vpop.eup %1033 }
 0x581   :  { %v866_v26 = vmul.f32 %v1034_v11, %v850_v17  ;;  %1035 = vpow2.f32 %v847_v34  ;;  %v345_v27 = vpop.permute.xlu2 %344 }
 0x582   :  { %356 = vst.msk [vmem:[%s1538_s3 + $0x8] sm:$0xff] %vm354_vm4, %v345_v27 }
 0x583   :  { %v867_v28 = vmul.f32 %v1034_v11, %v866_v26 }
 0x584   :  { %502 = vrot.lane.b32.xlu2 %v500_v29, %s1050_s24 }
 0x585   :  { %v868_v31 = vmul.f32 0.5, %v867_v28 }
 0x587   :  { %v1036_v32 = vpop.eup %1035  ;;  %v869_v33 = vsub.f32 1.5, %v868_v31 }
 0x588   :  { %v852_v35 = vadd.f32 0.0001, %v1036_v32 }
 0x589   :  { %v870_v24 = vmul.f32 %v1034_v11, %v869_v33  ;;  %v366_v36 = vpop.permute.xlu2 %365 }
 0x58a   :  { %377 = vst.msk [vmem:[%s1538_s3 + $0x8] sm:$0xff] %vm375_vm8, %v366_v36  ;;  %1037 = vrsqrt.f32 %v852_v35  ;;  %vm896_vm6 = vcmp.eq.f32.partialorder %v852_v35, inf  ;;  %v899_v52 = vand.u32 2147483648, %v852_v35  ;;  %vm898_vm5 = vcmp.eq.f32.partialorder %v852_v35, 0.0 }
 0x58b   :  { %v871_v37 = vmul.f32 %v870_v24, %v850_v17 }
 0x58d   :  { %v873_v38 = vsel %vm872_vm2, %v850_v17, %v871_v37 }
 0x58e   :  { %v876_v56 = vsel %vm874_vm3, %v875_v23, %v873_v38 }
 0x58f   :  { %v902_v39 = vsel %vm285_vm7, %v876_v56, %v829_v12 }
 0x590   :  { %v1038_v42 = vpop.eup %1037  ;;  %928 = vst.msk [vmem:[%s1538_s3 + $0x30] sm:$0xff] %vm118_vm12, %v902_v39  ;;  %v916_v43 = vmul.f32 %v1409_v3, %v902_v39  ;;  %v832_v3 = vadd.f32 %v1462_v50, %v831_v15  ;;  %vm937_vm12 = vcmask 392448  }
 0x591   :  { %v890_v44 = vmul.f32 %v1038_v42, %v852_v35 }
 0x592   :  { %921 = vrot.lane.b32.xlu0 %v916_v43, %s1046_s16  ;;  %v839_v55 = vmin.f32 %v832_v3, 88.0 }
 0x593   :  { %v891_v45 = vmul.f32 %v1038_v42, %v890_v44 }
 0x594   :  { %v845_v57 = vmul.f32 1.442695, %v839_v55 }
 0x595   :  { %v892_v46 = vmul.f32 0.5, %v891_v45 }
 0x596   :  { %1039 = vpow2.f32 %v845_v57 }
 0x597   :  { %v893_v47 = vsub.f32 1.5, %v892_v46 }
 0x599   :  { %v894_v48 = vmul.f32 %v1038_v42, %v893_v47 }
 0x59a   :  { %346 = vrot.lane.b32.xlu0 %v1287_v60, %s1045_s30 }
 0x59b   :  { %v895_v51 = vmul.f32 %v894_v48, %v852_v35 }
 0x59c   :  { %v1040_v61 = vpop.eup %1039 }
 0x59d   :  { %v897_v53 = vsel %vm896_vm6, %v852_v35, %v895_v51 }
 0x59e   :  { %v900_v40 = vsel %vm898_vm5, %v899_v52, %v897_v53 }
 0x59f   :  { %v904_v54 = vsel %vm285_vm7, %v900_v40, %v835_v21 }
 0x5a0   :  { %944 = vrot.lane.b32.xlu1 %v904_v54, %s1049_s19 }
 0x5a2   :  { %367 = vrot.lane.b32.xlu0 %v1344_v25, %s1049_s19  ;;  %v851_v25 = vadd.f32 0.0001, %v1040_v61 }
 0x5a4   :  { %1041 = vrsqrt.f32 %v851_v25  ;;  %vm884_vm10 = vcmp.eq.f32.partialorder %v851_v25, inf  ;;  %v887_v6 = vand.u32 2147483648, %v851_v25  ;;  %vm886_vm11 = vcmp.eq.f32.partialorder %v851_v25, 0.0 }
 0x5aa   :  { %v1042_v50 = vpop.eup %1041 }
 0x5ab   :  { %v878_v62 = vmul.f32 %v1042_v50, %v851_v25 }
 0x5ad   :  { %v879_v63 = vmul.f32 %v1042_v50, %v878_v62 }
 0x5af   :  { %v880_v30 = vmul.f32 0.5, %v879_v63 }
 0x5b1   :  { %v881_v0 = vsub.f32 1.5, %v880_v30 }
 0x5b3   :  { %v882_v1 = vmul.f32 %v1042_v50, %v881_v0 }
 0x5b5   :  { %v883_v49 = vmul.f32 %v882_v1, %v851_v25 }
 0x5b7   :  { %v885_v5 = vsel %vm884_vm10, %v851_v25, %v883_v49 }
 0x5b8   :  { %v888_v7 = vsel %vm886_vm11, %v887_v6, %v885_v5 }
 0x5b9   :  { %v903_v58 = vsel %vm285_vm7, %v888_v7, %v832_v3 }
 0x5d6   :  { %v932_v60 = vpop.permute.xlu2 %931 }
 0x5d7   :  { %938 = vst.msk [vmem:[%s1538_s3 + $0x28] sm:$0xff] %vm937_vm12, %v932_v60 }
 0x5de   :  { %v503_v59 = vpop.permute.xlu2 %502 }
 0x5df   :  { %506 = vst.msk [vmem:[%s1538_s3 + $0x20] sm:$0xff] %vm505_vm9, %v503_v59 }
 0x604   :  { %v922_v2 = vpop.permute.xlu0 %921 }
 0x605   :  { %v926_v4 = vadd.f32 %v922_v2, %v902_v39 }
 0x607   :  { %933 = vrot.lane.b32.xlu0 %v926_v4, %s1050_s24 }
 0x60c   :  { %v347_v8 = vpop.permute.xlu0 %346 }
 0x60d   :  { %357 = vst.msk [vmem:[%s1538_s3 + $0x10] sm:$0xff] %vm354_vm4, %v347_v8 }
 0x60f   :  { %942 = vrot.lane.b32.xlu0 %v903_v58, %s1049_s19 }
 0x612   :  { %v945_v12 = vpop.permute.xlu1 %944 }
 0x614   :  { %v368_v10 = vpop.permute.xlu0 %367 }
 0x615   :  { %378 = vst.msk [vmem:[%s1538_s3 + $0x10] sm:$0xff] %vm375_vm8, %v368_v10 }
 0x679   :  { %v934_v41 = vpop.permute.xlu0 %933 }
 0x67a   :  { %939 = vst.msk [vmem:[%s1538_s3 + $0x30] sm:$0xff] %vm937_vm12, %v934_v41 }
 0x67b   :  { %950 = vst.msk [vmem:[%s1538_s3 + $0x30] sm:$0xff] %vm948_vm13, %v945_v12 }
 0x681   :  { %v943_v9 = vpop.permute.xlu0 %942 }
 0x682   :  { %949 = vst.msk [vmem:[%s1538_s3 + $0x28] sm:$0xff] %vm948_vm13, %v943_v9 }

</bundles_post_ra>
